<compile_context>
chip_gen: v5e
topology: v5e:2x2
jax: 0.10.0
libtpu: 0.0.40
codegen_flags: <defaults>
</compile_context>

<pallas_src>
import math
import functools

import jax
import jax.numpy as jnp
from jax.experimental import pallas as pl
from jax.experimental.pallas import tpu as pltpu


def _encoder_layer_kernel(h, d_k, eps, fuse_kv, *refs):
    if fuse_kv:
        (cap_ref, img_ref, mask_ref,
         wq_ref, bq_ref, wkv_ref, bkv_ref,
         wo_ref, bo_ref, g_ref, beta_ref,
         w1_ref, b1_ref, w2_ref, b2_ref,
         o_ref, ctx_ref) = refs
    else:
        (cap_ref, img_ref, mask_ref,
         wq_ref, bq_ref, wk_ref, bk_ref, wv_ref, bv_ref,
         wo_ref, bo_ref, g_ref, beta_ref,
         w1_ref, b1_ref, w2_ref, b2_ref,
         o_ref, ctx_ref) = refs

    Bt, S, D = cap_ref.shape
    md = wq_ref.dtype                       # matmul operand dtype (bf16 here; f32 also valid)
    f32 = jnp.float32
    scale = jnp.float32(1.0 / math.sqrt(d_k))

    # ---- fused input projections: whole batch-block flattened into fat 2-D matmuls ----
    cap = cap_ref[...].reshape(Bt * S, D)                                   # (Bt*S, D) bf16
    img = img_ref[...].reshape(Bt * S, D)

    q2 = jnp.dot(cap, wq_ref[...], preferred_element_type=f32) + bq_ref[...]
    # Fold the softmax 1/sqrt(d_k) into q (Bt*S*D muls instead of h*Bt*S^2), then cast the
    # activations to the matmul dtype ONCE so the f32 projections die early.
    q = (q2 * scale).astype(md).reshape(Bt, S, D)

    if fuse_kv:
        kv2 = jnp.dot(img, wkv_ref[...], preferred_element_type=f32) + bkv_ref[...]
        kv = kv2.astype(md)                                                 # (Bt*S, 2D)
        k = kv[:, :D].reshape(Bt, S, D)                                     # tile-aligned split
        v = kv[:, D:].reshape(Bt, S, D)
    else:
        k = (jnp.dot(img, wk_ref[...], preferred_element_type=f32)
             + bk_ref[...]).astype(md).reshape(Bt, S, D)
        v = (jnp.dot(img, wv_ref[...], preferred_element_type=f32)
             + bv_ref[...]).astype(md).reshape(Bt, S, D)

    # ---- additive mask bias, computed once per block (mask 1.0 = masked out) ----
    mask_bias = mask_ref[...].astype(f32) * jnp.float32(-1e9)               # (Bt, S, S) f32

    # ---- per-head scaled dot-product attention (Python loop is unrolled at trace time).
    # Heads are static lane-slices of D (lane-dense when d_k % 128 == 0); K-transpose is
    # folded into the MXU contraction and head outputs merge through the bf16 ctx scratch.
    for hd in range(h):
        sl = slice(hd * d_k, (hd + 1) * d_k)
        q_h = q[:, :, sl]
        k_h = k[:, :, sl]
        v_h = v[:, :, sl]

        s = jnp.einsum('bqd,bkd->bqk', q_h, k_h, preferred_element_type=f32)
        s = s + mask_bias                                                   # (Bt, S, S) f32

        m = jnp.max(s, axis=-1, keepdims=True)
        e = jnp.exp(s - m)
        p = e * pl.reciprocal(jnp.sum(e, axis=-1, keepdims=True), approx=True)

        ctx_ref[:, :, sl] = jnp.einsum('bqk,bkd->bqd', p.astype(md), v_h,
                                       preferred_element_type=f32).astype(md)

    # ---- output projection over merged heads (one fat matmul, bf16 operands) ----
    ctx = ctx_ref[...].reshape(Bt * S, D)
    attn = jnp.dot(ctx, wo_ref[...], preferred_element_type=f32) + bo_ref[...]

    # ---- LayerNorm (PromptHate semantics: unbiased std, (std + eps) in the denominator) ----
    mean = jnp.mean(attn, axis=-1, keepdims=True)
    xc = attn - mean
    var = jnp.sum(xc * xc, axis=-1, keepdims=True) * jnp.float32(1.0 / (D - 1))
    inv = pl.reciprocal(jnp.sqrt(var) + eps, approx=True)
    normed = g_ref[...] * xc * inv + beta_ref[...]

    # ---- position-wise feed-forward + residual ----
    h1 = jnp.dot(normed.astype(md), w1_ref[...], preferred_element_type=f32) + b1_ref[...]
    h1 = jnp.maximum(h1, jnp.float32(0.0))
    ff = jnp.dot(h1.astype(md), w2_ref[...], preferred_element_type=f32) + b2_ref[...]

    out = attn + ff
    o_ref[...] = out.reshape(Bt, S, D).astype(o_ref.dtype)


def encoder_layer(img, cap, mask, params, *, h, eps=1e-6,
                  matmul_dtype=jnp.bfloat16, batch_block=None,
                  vmem_budget_bytes=48 * 2**20):
    """EncoderLayer forward. img/cap: (B, S, D) f32; mask: (B, S, S) f32 (1.0 = masked)."""
    B, S, D = img.shape
    assert cap.shape == (B, S, D) and mask.shape == (B, S, S)
    assert D % h == 0

    (wq, bq), (wk, bk), (wv, bv), (wo, bo), (g, beta), (w1, b1), (w2, b2) = params
    D_ff = w1.shape[1]
    md = matmul_dtype

    # K and V both project `img`: fuse into one (D, 2D) matmul ONLY if the output split
    # lands on a 128-lane tile boundary; otherwise keep separate matmuls (no relayout).
    fuse_kv = (D % 128 == 0)
    if fuse_kv:
        kv_args = (jnp.concatenate([wk, wv], axis=1).astype(md),
                   jnp.concatenate([bk, bv], axis=1))
    else:
        kv_args = (wk.astype(md), bk, wv.astype(md), bv)

    # bf16 operands for the MXU (f32 accumulation inside the kernel).  Biases, LayerNorm
    # params stay f32; the mask is bf16 ({0,1} exact) to halve the only O(S^2) DMA.
    cap_c, img_c = cap.astype(md), img.astype(md)
    mask_c = mask.astype(md)
    wq_c, wo_c, w1_c, w2_c = (w.astype(md) for w in (wq, wo, w1, w2))

    # ---- grid depth: up to 8 batch blocks so each TensorCore gets several pipelined steps.
    if batch_block is None:
        nb = min(B, 8)
        while B % nb:
            nb += 1
        batch_block = B // nb
    assert B % batch_block == 0

    # ---- VMEM accounting (v7x: 64 MiB physical / 32 MiB scoped default) ----
    def _vmem_estimate(bb):
        seq_tile = bb * S * D
        io = 2 * (2 * seq_tile * 2)            # cap + img tiles, bf16, double-buffered
        io += 2 * bb * S * S * 2               # mask tile, bf16, double-buffered
        io += 2 * seq_tile * 4                 # out tile, f32, double-buffered
        weights = 2 * (3 * D * D + 2 * D * D_ff)     # bf16 matmul weights (single-buffered)
        weights += 4 * (6 * D + 2 * D_ff)            # f32 biases + LayerNorm params
        scratch = seq_tile * 2                 # bf16 ctx
        live_f32 = 4 * (4 * seq_tile + 3 * bb * S * S + 2 * bb * S * D_ff)
        return int(1.3 * (io + weights + scratch + live_f32))

    while batch_block > 1 and _vmem_estimate(batch_block) > vmem_budget_bytes:
        nb = B // batch_block + 1
        while B % nb:
            nb += 1
        batch_block = B // nb
    num_blocks = B // batch_block
    vmem_limit = int(min(max(_vmem_estimate(batch_block), 32 * 2**20), 64 * 2**20))

    seq_spec = pl.BlockSpec((batch_block, S, D), lambda b: (b, 0, 0))
    mask_spec = pl.BlockSpec((batch_block, S, S), lambda b: (b, 0, 0))
    out_spec = pl.BlockSpec((batch_block, S, D), lambda b: (b, 0, 0))

    kernel = functools.partial(_encoder_layer_kernel, h, D // h, eps, fuse_kv)
    operands = (cap_c, img_c, mask_c, wq_c, bq, *kv_args,
                wo_c, bo, g, beta, w1_c, b1, w2_c, b2)

    def _run(const_pipeline_mode):
        spec_kwargs = ({} if const_pipeline_mode is None
                       else {"pipeline_mode": const_pipeline_mode})

        def const_spec(x):
            # Grid-invariant operand: constant index_map -> fetched once, VMEM-resident.
            return pl.BlockSpec(x.shape, lambda *_: (0,) * x.ndim, **spec_kwargs)

        in_specs = [seq_spec, seq_spec, mask_spec] + [const_spec(x) for x in operands[3:]]
        return pl.pallas_call(
            kernel,
            out_shape=jax.ShapeDtypeStruct((B, S, D), img.dtype),
            grid_spec=pltpu.PrefetchScalarGridSpec(
                num_scalar_prefetch=0,
                grid=(num_blocks,),
                in_specs=in_specs,
                out_specs=out_spec,
                scratch_shapes=[pltpu.VMEM((batch_block, S, D), md)],
            ),
            compiler_params=pltpu.CompilerParams(
                dimension_semantics=("parallel",),
                vmem_limit_bytes=vmem_limit),
        )(*operands)

    try:
        # Single-buffer the grid-invariant weights/biases (they never change across steps).
        return _run(pl.Buffered(1))
    except Exception:
        # Fallback: this JAX build rejects single-buffered constants -> default buffering.
        return _run(None)


def _reference_encoder_layer(img, cap, mask, params, *, h, eps=1e-6,
                             matmul_dtype=jnp.float32):
    """Pure-JAX reference mirroring the PyTorch forward (eval-mode dropout).

    `matmul_dtype` applies the same MXU-operand casts as the kernel so the comparison is
    apples-to-apples; with jnp.float32 it is the exact f32 module semantics.
    """
    B, S, D = img.shape
    d_k = D // h
    (wq, bq), (wk, bk), (wv, bv), (wo, bo), (g, beta), (w1, b1), (w2, b2) = params
    md = matmul_dtype
    f32 = jnp.float32

    def lin(x, w, b):
        return jnp.einsum('bsd,de->bse', x.astype(md), w.astype(md),
                          preferred_element_type=f32) + b

    q = lin(cap, wq, bq).reshape(B, S, h, d_k).transpose(0, 2, 1, 3)
    k = lin(img, wk, bk).reshape(B, S, h, d_k).transpose(0, 2, 1, 3)
    v = lin(img, wv, bv).reshape(B, S, h, d_k).transpose(0, 2, 1, 3)

    scores = jnp.einsum('bhqd,bhkd->bhqk', q.astype(md), k.astype(md),
                        preferred_element_type=f32) / math.sqrt(d_k)
    scores = jnp.where(mask[:, None, :, :] > 0.5, -1e9, scores)
    p = jax.nn.softmax(scores, axis=-1)
    ctx = jnp.einsum('bhqk,bhkd->bhqd', p.astype(md), v.astype(md),
                     preferred_element_type=f32)
    ctx = ctx.transpose(0, 2, 1, 3).reshape(B, S, D)
    attn = lin(ctx, wo, bo)

    mean = attn.mean(-1, keepdims=True)
    xc = attn - mean
    std = jnp.sqrt(jnp.sum(xc * xc, axis=-1, keepdims=True) / (D - 1))
    normed = g * xc / (std + eps) + beta

    h1 = jax.nn.relu(lin(normed, w1, b1))
    ff = lin(h1, w2, b2)
    return attn + ff


def _init_linear(key, d_in, d_out):
    """Deterministic init mimicking nn.Linear default (uniform +/- 1/sqrt(in))."""
    kw, kb = jax.random.split(key)
    bound = 1.0 / math.sqrt(d_in)
    w_t = jax.random.uniform(kw, (d_in, d_out), jnp.float32, -bound, bound)  # (in, out) = W.T
    b = jax.random.uniform(kb, (1, d_out), jnp.float32, -bound, bound)
    return w_t, b


def _make_case(key, B, S, D, D_FF):
    (k_img, k_cap, k_m, k_q, k_k, k_v, k_o, k_ln, k_f1, k_f2) = jax.random.split(key, 10)

    img = jax.random.normal(k_img, (B, S, D), jnp.float32)
    cap = jax.random.normal(k_cap, (B, S, D), jnp.float32)

    # Boolean mask (True = masked); keep column 0 unmasked so no row is fully masked.
    mask_bool = jax.random.bernoulli(k_m, 0.2, (B, S, S))
    mask_bool = mask_bool.at[:, :, 0].set(False)
    mask = mask_bool.astype(jnp.float32)

    kg, kb2 = jax.random.split(k_ln)
    params = (
        _init_linear(k_q, D, D),            # attention linears[0]: query proj (input = cap)
        _init_linear(k_k, D, D),            # attention linears[1]: key proj   (input = img)
        _init_linear(k_v, D, D),            # attention linears[2]: value proj (input = img)
        _init_linear(k_o, D, D),            # attention linears[3]: output proj
        # LayerNorm a_2 / b_2 (module inits ones/zeros; perturbed here to exercise them)
        (1.0 + 0.5 * jax.random.uniform(kg, (1, D), jnp.float32, -1.0, 1.0),
         0.1 * jax.random.uniform(kb2, (1, D), jnp.float32, -1.0, 1.0)),
        _init_linear(k_f1, D, D_FF),        # feed_forward w_1
        _init_linear(k_f2, D_FF, D),        # feed_forward w_2
    )
    return img, cap, mask, params


def _check_case(tag, key, B, S, D, H, D_FF):
    img, cap, mask, params = _make_case(key, B, S, D, D_FF)
    out = encoder_layer(img, cap, mask, params, h=H)
    out = jax.block_until_ready(out)

    # Reference with the same bf16 MXU-operand policy (exact softmax / exact reciprocals);
    # tolerance covers the EUP approx-reciprocal + bf16-rounding straddle differences.
    ref = _reference_encoder_layer(img, cap, mask, params, h=H,
                                   matmul_dtype=jnp.bfloat16)
    assert out.shape == (B, S, D)
    err = float(jnp.max(jnp.abs(out - ref)))
    assert jnp.allclose(out, ref, atol=3e-2, rtol=3e-2), (
        f"Pallas EncoderLayer mismatch vs reference [{tag}], max abs err {err}")


if __name__ == "__main__":
    root = jax.random.PRNGKey(0)
    k_toy, k_dense = jax.random.split(root)

    # Toy config (separate-K/V path, per-head loop with d_k < 128).
    _check_case("toy", k_toy, B=2, S=8, D=32, H=4, D_FF=64)
    # Lane-dense config (fused-KV path, 128-wide heads, 128-deep key axis, 4 grid steps).
    _check_case("lane-dense", k_dense, B=4, S=128, D=256, H=2, D_FF=512)

    print("KERNEL_OK")
</pallas_src>

<mosaic_0001>
module attributes {stable_mosaic.version = 11 : i64} {
  func.func @_encoder_layer_kernel(%arg0: i32, %arg1: memref<1x8x32xbf16, #tpu.memory_space<vmem>>, %arg2: memref<1x8x32xbf16, #tpu.memory_space<vmem>>, %arg3: memref<1x8x8xbf16, #tpu.memory_space<vmem>>, %arg4: memref<32x32xbf16, #tpu.memory_space<vmem>>, %arg5: memref<1x32xf32, #tpu.memory_space<vmem>>, %arg6: memref<32x32xbf16, #tpu.memory_space<vmem>>, %arg7: memref<1x32xf32, #tpu.memory_space<vmem>>, %arg8: memref<32x32xbf16, #tpu.memory_space<vmem>>, %arg9: memref<1x32xf32, #tpu.memory_space<vmem>>, %arg10: memref<32x32xbf16, #tpu.memory_space<vmem>>, %arg11: memref<1x32xf32, #tpu.memory_space<vmem>>, %arg12: memref<1x32xf32, #tpu.memory_space<vmem>>, %arg13: memref<1x32xf32, #tpu.memory_space<vmem>>, %arg14: memref<32x64xbf16, #tpu.memory_space<vmem>>, %arg15: memref<1x64xf32, #tpu.memory_space<vmem>>, %arg16: memref<64x32xbf16, #tpu.memory_space<vmem>>, %arg17: memref<1x32xf32, #tpu.memory_space<vmem>>, %arg18: memref<1x8x32xf32, #tpu.memory_space<vmem>>, %arg19: memref<1x8x32xbf16, #tpu.memory_space<vmem>>) attributes {dimension_semantics = [#tpu.dimension_semantics<parallel>], iteration_bounds = array<i64: 2>, scalar_prefetch = 0 : i64, scratch_operands = 1 : i64, tpu.core_type = #tpu.core_type<tc>, window_params = [{transform_indices = @transform_0, window_bounds = array<i64: 1, 8, 32>}, {transform_indices = @transform_1, window_bounds = array<i64: 1, 8, 32>}, {transform_indices = @transform_2, window_bounds = array<i64: 1, 8, 8>}, {pipeline_mode = #tpu.pipeline_mode<synchronous>, transform_indices = @transform_3, window_bounds = array<i64: 32, 32>}, {pipeline_mode = #tpu.pipeline_mode<synchronous>, transform_indices = @transform_4, window_bounds = array<i64: 1, 32>}, {pipeline_mode = #tpu.pipeline_mode<synchronous>, transform_indices = @transform_5, window_bounds = array<i64: 32, 32>}, {pipeline_mode = #tpu.pipeline_mode<synchronous>, transform_indices = @transform_6, window_bounds = array<i64: 1, 32>}, {pipeline_mode = #tpu.pipeline_mode<synchronous>, transform_indices = @transform_7, window_bounds = array<i64: 32, 32>}, {pipeline_mode = #tpu.pipeline_mode<synchronous>, transform_indices = @transform_8, window_bounds = array<i64: 1, 32>}, {pipeline_mode = #tpu.pipeline_mode<synchronous>, transform_indices = @transform_9, window_bounds = array<i64: 32, 32>}, {pipeline_mode = #tpu.pipeline_mode<synchronous>, transform_indices = @transform_10, window_bounds = array<i64: 1, 32>}, {pipeline_mode = #tpu.pipeline_mode<synchronous>, transform_indices = @transform_11, window_bounds = array<i64: 1, 32>}, {pipeline_mode = #tpu.pipeline_mode<synchronous>, transform_indices = @transform_12, window_bounds = array<i64: 1, 32>}, {pipeline_mode = #tpu.pipeline_mode<synchronous>, transform_indices = @transform_13, window_bounds = array<i64: 32, 64>}, {pipeline_mode = #tpu.pipeline_mode<synchronous>, transform_indices = @transform_14, window_bounds = array<i64: 1, 64>}, {pipeline_mode = #tpu.pipeline_mode<synchronous>, transform_indices = @transform_15, window_bounds = array<i64: 64, 32>}, {pipeline_mode = #tpu.pipeline_mode<synchronous>, transform_indices = @transform_16, window_bounds = array<i64: 1, 32>}, {transform_indices = @transform_17, window_bounds = array<i64: 1, 8, 32>}]} {
    %c0 = arith.constant 0 : index
    %c0_0 = arith.constant 0 : index
    %c0_1 = arith.constant 0 : index
    %0 = vector.load %arg1[%c0, %c0_0, %c0_1] : memref<1x8x32xbf16, #tpu.memory_space<vmem>>, vector<1x8x32xbf16>
    %1 = vector.shape_cast %0 : vector<1x8x32xbf16> to vector<8x32xbf16>
    %c0_2 = arith.constant 0 : index
    %c0_3 = arith.constant 0 : index
    %c0_4 = arith.constant 0 : index
    %2 = vector.load %arg2[%c0_2, %c0_3, %c0_4] : memref<1x8x32xbf16, #tpu.memory_space<vmem>>, vector<1x8x32xbf16>
    %3 = vector.shape_cast %2 : vector<1x8x32xbf16> to vector<8x32xbf16>
    %c0_5 = arith.constant 0 : index
    %c0_6 = arith.constant 0 : index
    %4 = vector.load %arg4[%c0_5, %c0_6] : memref<32x32xbf16, #tpu.memory_space<vmem>>, vector<32x32xbf16>
    %cst = arith.constant dense<0.000000e+00> : vector<8x32xf32>
    %5 = tpu.matmul %1, %4, %cst {dimension_numbers = #tpu.dot_dimension_numbers<[1], [0], [0], [1], [0, 0, 1, 1], [], []>} : vector<8x32xbf16>, vector<32x32xbf16>, vector<8x32xf32> -> vector<8x32xf32>
    %c0_7 = arith.constant 0 : index
    %c0_8 = arith.constant 0 : index
    %6 = vector.load %arg5[%c0_7, %c0_8] : memref<1x32xf32, #tpu.memory_space<vmem>>, vector<1x32xf32>
    %7 = vector.broadcast %6 : vector<1x32xf32> to vector<8x32xf32>
    %8 = arith.addf %5, %7 : vector<8x32xf32>
    %cst_9 = arith.constant 0.353553385 : f32
    %9 = vector.broadcast %cst_9 : f32 to vector<8x32xf32>
    %10 = arith.mulf %8, %9 : vector<8x32xf32>
    %11 = arith.truncf %10 : vector<8x32xf32> to vector<8x32xbf16>
    %12 = vector.shape_cast %11 : vector<8x32xbf16> to vector<1x8x32xbf16>
    %c0_10 = arith.constant 0 : index
    %c0_11 = arith.constant 0 : index
    %13 = vector.load %arg6[%c0_10, %c0_11] : memref<32x32xbf16, #tpu.memory_space<vmem>>, vector<32x32xbf16>
    %cst_12 = arith.constant dense<0.000000e+00> : vector<8x32xf32>
    %14 = tpu.matmul %3, %13, %cst_12 {dimension_numbers = #tpu.dot_dimension_numbers<[1], [0], [0], [1], [0, 0, 1, 1], [], []>} : vector<8x32xbf16>, vector<32x32xbf16>, vector<8x32xf32> -> vector<8x32xf32>
    %c0_13 = arith.constant 0 : index
    %c0_14 = arith.constant 0 : index
    %15 = vector.load %arg7[%c0_13, %c0_14] : memref<1x32xf32, #tpu.memory_space<vmem>>, vector<1x32xf32>
    %16 = vector.broadcast %15 : vector<1x32xf32> to vector<8x32xf32>
    %17 = arith.addf %14, %16 : vector<8x32xf32>
    %18 = arith.truncf %17 : vector<8x32xf32> to vector<8x32xbf16>
    %19 = vector.shape_cast %18 : vector<8x32xbf16> to vector<1x8x32xbf16>
    %c0_15 = arith.constant 0 : index
    %c0_16 = arith.constant 0 : index
    %20 = vector.load %arg8[%c0_15, %c0_16] : memref<32x32xbf16, #tpu.memory_space<vmem>>, vector<32x32xbf16>
    %cst_17 = arith.constant dense<0.000000e+00> : vector<8x32xf32>
    %21 = tpu.matmul %3, %20, %cst_17 {dimension_numbers = #tpu.dot_dimension_numbers<[1], [0], [0], [1], [0, 0, 1, 1], [], []>} : vector<8x32xbf16>, vector<32x32xbf16>, vector<8x32xf32> -> vector<8x32xf32>
    %c0_18 = arith.constant 0 : index
    %c0_19 = arith.constant 0 : index
    %22 = vector.load %arg9[%c0_18, %c0_19] : memref<1x32xf32, #tpu.memory_space<vmem>>, vector<1x32xf32>
    %23 = vector.broadcast %22 : vector<1x32xf32> to vector<8x32xf32>
    %24 = arith.addf %21, %23 : vector<8x32xf32>
    %25 = arith.truncf %24 : vector<8x32xf32> to vector<8x32xbf16>
    %26 = vector.shape_cast %25 : vector<8x32xbf16> to vector<1x8x32xbf16>
    %c0_20 = arith.constant 0 : index
    %c0_21 = arith.constant 0 : index
    %c0_22 = arith.constant 0 : index
    %27 = vector.load %arg3[%c0_20, %c0_21, %c0_22] : memref<1x8x8xbf16, #tpu.memory_space<vmem>>, vector<1x8x8xbf16>
    %28 = arith.extf %27 : vector<1x8x8xbf16> to vector<1x8x8xf32>
    %cst_23 = arith.constant -1.000000e+09 : f32
    %29 = vector.broadcast %cst_23 : f32 to vector<1x8x8xf32>
    %30 = arith.mulf %28, %29 : vector<1x8x8xf32>
    %31 = vector.extract_strided_slice %12 {offsets = [0, 0, 0], sizes = [1, 8, 8], strides = [1, 1, 1]} : vector<1x8x32xbf16> to vector<1x8x8xbf16>
    %32 = vector.extract_strided_slice %19 {offsets = [0, 0, 0], sizes = [1, 8, 8], strides = [1, 1, 1]} : vector<1x8x32xbf16> to vector<1x8x8xbf16>
    %33 = vector.extract_strided_slice %26 {offsets = [0, 0, 0], sizes = [1, 8, 8], strides = [1, 1, 1]} : vector<1x8x32xbf16> to vector<1x8x8xbf16>
    "tpu.trace_start"() <{level = 10 : i32, message = "bqd,bkd->bqk"}> : () -> ()
    %cst_24 = arith.constant dense<0.000000e+00> : vector<1x8x8xf32>
    %34 = tpu.matmul %31, %32, %cst_24 {dimension_numbers = #tpu.dot_dimension_numbers<[2], [2], [1], [1], [0, 0, 0, 1, 1, 1], [0], [0]>} : vector<1x8x8xbf16>, vector<1x8x8xbf16>, vector<1x8x8xf32> -> vector<1x8x8xf32>
    "tpu.trace_stop"() : () -> ()
    %35 = arith.addf %34, %30 : vector<1x8x8xf32>
    %cst_25 = arith.constant dense<0xFF800000> : vector<1x8xf32>
    %36 = vector.multi_reduction <maximumf>, %35, %cst_25 [2] : vector<1x8x8xf32> to vector<1x8xf32>
    %37 = vector.shape_cast %36 : vector<1x8xf32> to vector<1x8x1xf32>
    %38 = vector.broadcast %37 : vector<1x8x1xf32> to vector<1x8x8xf32>
    %39 = arith.subf %35, %38 : vector<1x8x8xf32>
    %40 = math.exp %39 : vector<1x8x8xf32>
    %cst_26 = arith.constant dense<0.000000e+00> : vector<1x8xf32>
    %41 = vector.multi_reduction <add>, %40, %cst_26 [2] : vector<1x8x8xf32> to vector<1x8xf32>
    %42 = vector.shape_cast %41 : vector<1x8xf32> to vector<1x8x1xf32>
    %43 = tpu.reciprocal %42 {approx = true} : vector<1x8x1xf32> -> vector<1x8x1xf32>
    %44 = vector.broadcast %43 : vector<1x8x1xf32> to vector<1x8x8xf32>
    %45 = arith.mulf %40, %44 : vector<1x8x8xf32>
    %46 = arith.truncf %45 : vector<1x8x8xf32> to vector<1x8x8xbf16>
    "tpu.trace_start"() <{level = 10 : i32, message = "bqk,bkd->bqd"}> : () -> ()
    %cst_27 = arith.constant dense<0.000000e+00> : vector<1x8x8xf32>
    %47 = tpu.matmul %46, %33, %cst_27 {dimension_numbers = #tpu.dot_dimension_numbers<[2], [1], [1], [2], [0, 0, 0, 1, 1, 2], [0], [0]>} : vector<1x8x8xbf16>, vector<1x8x8xbf16>, vector<1x8x8xf32> -> vector<1x8x8xf32>
    "tpu.trace_stop"() : () -> ()
    %48 = arith.truncf %47 : vector<1x8x8xf32> to vector<1x8x8xbf16>
    %c0_28 = arith.constant 0 : index
    %c0_29 = arith.constant 0 : index
    %c0_30 = arith.constant 0 : index
    %49 = vector.load %arg19[%c0_28, %c0_29, %c0_30] : memref<1x8x32xbf16, #tpu.memory_space<vmem>>, vector<1x8x8xbf16>
    tpu.vector_store %arg19[%c0_28, %c0_29, %c0_30], %48 {strides = array<i32>} : memref<1x8x32xbf16, #tpu.memory_space<vmem>>, vector<1x8x8xbf16>,
    %50 = vector.extract_strided_slice %12 {offsets = [0, 0, 8], sizes = [1, 8, 8], strides = [1, 1, 1]} : vector<1x8x32xbf16> to vector<1x8x8xbf16>
    %51 = vector.extract_strided_slice %19 {offsets = [0, 0, 8], sizes = [1, 8, 8], strides = [1, 1, 1]} : vector<1x8x32xbf16> to vector<1x8x8xbf16>
    %52 = vector.extract_strided_slice %26 {offsets = [0, 0, 8], sizes = [1, 8, 8], strides = [1, 1, 1]} : vector<1x8x32xbf16> to vector<1x8x8xbf16>
    "tpu.trace_start"() <{level = 10 : i32, message = "bqd,bkd->bqk"}> : () -> ()
    %cst_31 = arith.constant dense<0.000000e+00> : vector<1x8x8xf32>
    %53 = tpu.matmul %50, %51, %cst_31 {dimension_numbers = #tpu.dot_dimension_numbers<[2], [2], [1], [1], [0, 0, 0, 1, 1, 1], [0], [0]>} : vector<1x8x8xbf16>, vector<1x8x8xbf16>, vector<1x8x8xf32> -> vector<1x8x8xf32>
    "tpu.trace_stop"() : () -> ()
    %54 = arith.addf %53, %30 : vector<1x8x8xf32>
    %cst_32 = arith.constant dense<0xFF800000> : vector<1x8xf32>
    %55 = vector.multi_reduction <maximumf>, %54, %cst_32 [2] : vector<1x8x8xf32> to vector<1x8xf32>
    %56 = vector.shape_cast %55 : vector<1x8xf32> to vector<1x8x1xf32>
    %57 = vector.broadcast %56 : vector<1x8x1xf32> to vector<1x8x8xf32>
    %58 = arith.subf %54, %57 : vector<1x8x8xf32>
    %59 = math.exp %58 : vector<1x8x8xf32>
    %cst_33 = arith.constant dense<0.000000e+00> : vector<1x8xf32>
    %60 = vector.multi_reduction <add>, %59, %cst_33 [2] : vector<1x8x8xf32> to vector<1x8xf32>
    %61 = vector.shape_cast %60 : vector<1x8xf32> to vector<1x8x1xf32>
    %62 = tpu.reciprocal %61 {approx = true} : vector<1x8x1xf32> -> vector<1x8x1xf32>
    %63 = vector.broadcast %62 : vector<1x8x1xf32> to vector<1x8x8xf32>
    %64 = arith.mulf %59, %63 : vector<1x8x8xf32>
    %65 = arith.truncf %64 : vector<1x8x8xf32> to vector<1x8x8xbf16>
    "tpu.trace_start"() <{level = 10 : i32, message = "bqk,bkd->bqd"}> : () -> ()
    %cst_34 = arith.constant dense<0.000000e+00> : vector<1x8x8xf32>
    %66 = tpu.matmul %65, %52, %cst_34 {dimension_numbers = #tpu.dot_dimension_numbers<[2], [1], [1], [2], [0, 0, 0, 1, 1, 2], [0], [0]>} : vector<1x8x8xbf16>, vector<1x8x8xbf16>, vector<1x8x8xf32> -> vector<1x8x8xf32>
    "tpu.trace_stop"() : () -> ()
    %67 = arith.truncf %66 : vector<1x8x8xf32> to vector<1x8x8xbf16>
    %c0_35 = arith.constant 0 : index
    %c0_36 = arith.constant 0 : index
    %c8 = arith.constant 8 : index
    %68 = vector.load %arg19[%c0_35, %c0_36, %c8] : memref<1x8x32xbf16, #tpu.memory_space<vmem>>, vector<1x8x8xbf16>
    tpu.vector_store %arg19[%c0_35, %c0_36, %c8], %67 {strides = array<i32>} : memref<1x8x32xbf16, #tpu.memory_space<vmem>>, vector<1x8x8xbf16>,
    %69 = vector.extract_strided_slice %12 {offsets = [0, 0, 16], sizes = [1, 8, 8], strides = [1, 1, 1]} : vector<1x8x32xbf16> to vector<1x8x8xbf16>
    %70 = vector.extract_strided_slice %19 {offsets = [0, 0, 16], sizes = [1, 8, 8], strides = [1, 1, 1]} : vector<1x8x32xbf16> to vector<1x8x8xbf16>
    %71 = vector.extract_strided_slice %26 {offsets = [0, 0, 16], sizes = [1, 8, 8], strides = [1, 1, 1]} : vector<1x8x32xbf16> to vector<1x8x8xbf16>
    "tpu.trace_start"() <{level = 10 : i32, message = "bqd,bkd->bqk"}> : () -> ()
    %cst_37 = arith.constant dense<0.000000e+00> : vector<1x8x8xf32>
    %72 = tpu.matmul %69, %70, %cst_37 {dimension_numbers = #tpu.dot_dimension_numbers<[2], [2], [1], [1], [0, 0, 0, 1, 1, 1], [0], [0]>} : vector<1x8x8xbf16>, vector<1x8x8xbf16>, vector<1x8x8xf32> -> vector<1x8x8xf32>
    "tpu.trace_stop"() : () -> ()
    %73 = arith.addf %72, %30 : vector<1x8x8xf32>
    %cst_38 = arith.constant dense<0xFF800000> : vector<1x8xf32>
    %74 = vector.multi_reduction <maximumf>, %73, %cst_38 [2] : vector<1x8x8xf32> to vector<1x8xf32>
    %75 = vector.shape_cast %74 : vector<1x8xf32> to vector<1x8x1xf32>
    %76 = vector.broadcast %75 : vector<1x8x1xf32> to vector<1x8x8xf32>
    %77 = arith.subf %73, %76 : vector<1x8x8xf32>
    %78 = math.exp %77 : vector<1x8x8xf32>
    %cst_39 = arith.constant dense<0.000000e+00> : vector<1x8xf32>
    %79 = vector.multi_reduction <add>, %78, %cst_39 [2] : vector<1x8x8xf32> to vector<1x8xf32>
    %80 = vector.shape_cast %79 : vector<1x8xf32> to vector<1x8x1xf32>
    %81 = tpu.reciprocal %80 {approx = true} : vector<1x8x1xf32> -> vector<1x8x1xf32>
    %82 = vector.broadcast %81 : vector<1x8x1xf32> to vector<1x8x8xf32>
    %83 = arith.mulf %78, %82 : vector<1x8x8xf32>
    %84 = arith.truncf %83 : vector<1x8x8xf32> to vector<1x8x8xbf16>
    "tpu.trace_start"() <{level = 10 : i32, message = "bqk,bkd->bqd"}> : () -> ()
    %cst_40 = arith.constant dense<0.000000e+00> : vector<1x8x8xf32>
    %85 = tpu.matmul %84, %71, %cst_40 {dimension_numbers = #tpu.dot_dimension_numbers<[2], [1], [1], [2], [0, 0, 0, 1, 1, 2], [0], [0]>} : vector<1x8x8xbf16>, vector<1x8x8xbf16>, vector<1x8x8xf32> -> vector<1x8x8xf32>
    "tpu.trace_stop"() : () -> ()
    %86 = arith.truncf %85 : vector<1x8x8xf32> to vector<1x8x8xbf16>
    %c0_41 = arith.constant 0 : index
    %c0_42 = arith.constant 0 : index
    %c16 = arith.constant 16 : index
    %87 = vector.load %arg19[%c0_41, %c0_42, %c16] : memref<1x8x32xbf16, #tpu.memory_space<vmem>>, vector<1x8x8xbf16>
    tpu.vector_store %arg19[%c0_41, %c0_42, %c16], %86 {strides = array<i32>} : memref<1x8x32xbf16, #tpu.memory_space<vmem>>, vector<1x8x8xbf16>,
    %88 = vector.extract_strided_slice %12 {offsets = [0, 0, 24], sizes = [1, 8, 8], strides = [1, 1, 1]} : vector<1x8x32xbf16> to vector<1x8x8xbf16>
    %89 = vector.extract_strided_slice %19 {offsets = [0, 0, 24], sizes = [1, 8, 8], strides = [1, 1, 1]} : vector<1x8x32xbf16> to vector<1x8x8xbf16>
    %90 = vector.extract_strided_slice %26 {offsets = [0, 0, 24], sizes = [1, 8, 8], strides = [1, 1, 1]} : vector<1x8x32xbf16> to vector<1x8x8xbf16>
    "tpu.trace_start"() <{level = 10 : i32, message = "bqd,bkd->bqk"}> : () -> ()
    %cst_43 = arith.constant dense<0.000000e+00> : vector<1x8x8xf32>
    %91 = tpu.matmul %88, %89, %cst_43 {dimension_numbers = #tpu.dot_dimension_numbers<[2], [2], [1], [1], [0, 0, 0, 1, 1, 1], [0], [0]>} : vector<1x8x8xbf16>, vector<1x8x8xbf16>, vector<1x8x8xf32> -> vector<1x8x8xf32>
    "tpu.trace_stop"() : () -> ()
    %92 = arith.addf %91, %30 : vector<1x8x8xf32>
    %cst_44 = arith.constant dense<0xFF800000> : vector<1x8xf32>
    %93 = vector.multi_reduction <maximumf>, %92, %cst_44 [2] : vector<1x8x8xf32> to vector<1x8xf32>
    %94 = vector.shape_cast %93 : vector<1x8xf32> to vector<1x8x1xf32>
    %95 = vector.broadcast %94 : vector<1x8x1xf32> to vector<1x8x8xf32>
    %96 = arith.subf %92, %95 : vector<1x8x8xf32>
    %97 = math.exp %96 : vector<1x8x8xf32>
    %cst_45 = arith.constant dense<0.000000e+00> : vector<1x8xf32>
    %98 = vector.multi_reduction <add>, %97, %cst_45 [2] : vector<1x8x8xf32> to vector<1x8xf32>
    %99 = vector.shape_cast %98 : vector<1x8xf32> to vector<1x8x1xf32>
    %100 = tpu.reciprocal %99 {approx = true} : vector<1x8x1xf32> -> vector<1x8x1xf32>
    %101 = vector.broadcast %100 : vector<1x8x1xf32> to vector<1x8x8xf32>
    %102 = arith.mulf %97, %101 : vector<1x8x8xf32>
    %103 = arith.truncf %102 : vector<1x8x8xf32> to vector<1x8x8xbf16>
    "tpu.trace_start"() <{level = 10 : i32, message = "bqk,bkd->bqd"}> : () -> ()
    %cst_46 = arith.constant dense<0.000000e+00> : vector<1x8x8xf32>
    %104 = tpu.matmul %103, %90, %cst_46 {dimension_numbers = #tpu.dot_dimension_numbers<[2], [1], [1], [2], [0, 0, 0, 1, 1, 2], [0], [0]>} : vector<1x8x8xbf16>, vector<1x8x8xbf16>, vector<1x8x8xf32> -> vector<1x8x8xf32>
    "tpu.trace_stop"() : () -> ()
    %105 = arith.truncf %104 : vector<1x8x8xf32> to vector<1x8x8xbf16>
    %c0_47 = arith.constant 0 : index
    %c0_48 = arith.constant 0 : index
    %c24 = arith.constant 24 : index
    %106 = vector.load %arg19[%c0_47, %c0_48, %c24] : memref<1x8x32xbf16, #tpu.memory_space<vmem>>, vector<1x8x8xbf16>
    tpu.vector_store %arg19[%c0_47, %c0_48, %c24], %105 {strides = array<i32>} : memref<1x8x32xbf16, #tpu.memory_space<vmem>>, vector<1x8x8xbf16>,
    %c0_49 = arith.constant 0 : index
    %c0_50 = arith.constant 0 : index
    %c0_51 = arith.constant 0 : index
    %107 = vector.load %arg19[%c0_49, %c0_50, %c0_51] : memref<1x8x32xbf16, #tpu.memory_space<vmem>>, vector<1x8x32xbf16>
    %108 = vector.shape_cast %107 : vector<1x8x32xbf16> to vector<8x32xbf16>
    %c0_52 = arith.constant 0 : index
    %c0_53 = arith.constant 0 : index
    %109 = vector.load %arg10[%c0_52, %c0_53] : memref<32x32xbf16, #tpu.memory_space<vmem>>, vector<32x32xbf16>
    %cst_54 = arith.constant dense<0.000000e+00> : vector<8x32xf32>
    %110 = tpu.matmul %108, %109, %cst_54 {dimension_numbers = #tpu.dot_dimension_numbers<[1], [0], [0], [1], [0, 0, 1, 1], [], []>} : vector<8x32xbf16>, vector<32x32xbf16>, vector<8x32xf32> -> vector<8x32xf32>
    %c0_55 = arith.constant 0 : index
    %c0_56 = arith.constant 0 : index
    %111 = vector.load %arg11[%c0_55, %c0_56] : memref<1x32xf32, #tpu.memory_space<vmem>>, vector<1x32xf32>
    %112 = vector.broadcast %111 : vector<1x32xf32> to vector<8x32xf32>
    %113 = arith.addf %110, %112 : vector<8x32xf32>
    %cst_57 = arith.constant dense<0.000000e+00> : vector<8xf32>
    %114 = vector.multi_reduction <add>, %113, %cst_57 [1] : vector<8x32xf32> to vector<8xf32>
    %115 = vector.shape_cast %114 : vector<8xf32> to vector<8x1xf32>
    %cst_58 = arith.constant 3.200000e+01 : f32
    %116 = vector.broadcast %cst_58 : f32 to vector<8x1xf32>
    %117 = arith.divf %115, %116 : vector<8x1xf32>
    %118 = vector.broadcast %117 : vector<8x1xf32> to vector<8x32xf32>
    %119 = arith.subf %113, %118 : vector<8x32xf32>
    %120 = arith.mulf %119, %119 : vector<8x32xf32>
    %cst_59 = arith.constant dense<0.000000e+00> : vector<8xf32>
    %121 = vector.multi_reduction <add>, %120, %cst_59 [1] : vector<8x32xf32> to vector<8xf32>
    %122 = vector.shape_cast %121 : vector<8xf32> to vector<8x1xf32>
    %cst_60 = arith.constant 0.0322580636 : f32
    %123 = vector.broadcast %cst_60 : f32 to vector<8x1xf32>
    %124 = arith.mulf %122, %123 : vector<8x1xf32>
    %125 = math.sqrt %124 : vector<8x1xf32>
    %cst_61 = arith.constant 9.99999997E-7 : f32
    %126 = vector.broadcast %cst_61 : f32 to vector<8x1xf32>
    %127 = arith.addf %125, %126 : vector<8x1xf32>
    %128 = tpu.reciprocal %127 {approx = true} : vector<8x1xf32> -> vector<8x1xf32>
    %c0_62 = arith.constant 0 : index
    %c0_63 = arith.constant 0 : index
    %129 = vector.load %arg12[%c0_62, %c0_63] : memref<1x32xf32, #tpu.memory_space<vmem>>, vector<1x32xf32>
    %130 = vector.broadcast %129 : vector<1x32xf32> to vector<8x32xf32>
    %131 = arith.mulf %130, %119 : vector<8x32xf32>
    %132 = vector.broadcast %128 : vector<8x1xf32> to vector<8x32xf32>
    %133 = arith.mulf %131, %132 : vector<8x32xf32>
    %c0_64 = arith.constant 0 : index
    %c0_65 = arith.constant 0 : index
    %134 = vector.load %arg13[%c0_64, %c0_65] : memref<1x32xf32, #tpu.memory_space<vmem>>, vector<1x32xf32>
    %135 = vector.broadcast %134 : vector<1x32xf32> to vector<8x32xf32>
    %136 = arith.addf %133, %135 : vector<8x32xf32>
    %137 = arith.truncf %136 : vector<8x32xf32> to vector<8x32xbf16>
    %c0_66 = arith.constant 0 : index
    %c0_67 = arith.constant 0 : index
    %138 = vector.load %arg14[%c0_66, %c0_67] : memref<32x64xbf16, #tpu.memory_space<vmem>>, vector<32x64xbf16>
    %cst_68 = arith.constant dense<0.000000e+00> : vector<8x64xf32>
    %139 = tpu.matmul %137, %138, %cst_68 {dimension_numbers = #tpu.dot_dimension_numbers<[1], [0], [0], [1], [0, 0, 1, 1], [], []>} : vector<8x32xbf16>, vector<32x64xbf16>, vector<8x64xf32> -> vector<8x64xf32>
    %c0_69 = arith.constant 0 : index
    %c0_70 = arith.constant 0 : index
    %140 = vector.load %arg15[%c0_69, %c0_70] : memref<1x64xf32, #tpu.memory_space<vmem>>, vector<1x64xf32>
    %141 = vector.broadcast %140 : vector<1x64xf32> to vector<8x64xf32>
    %142 = arith.addf %139, %141 : vector<8x64xf32>
    %cst_71 = arith.constant 0.000000e+00 : f32
    %143 = vector.broadcast %cst_71 : f32 to vector<8x64xf32>
    %144 = arith.maximumf %142, %143 : vector<8x64xf32>
    %145 = arith.truncf %144 : vector<8x64xf32> to vector<8x64xbf16>
    %c0_72 = arith.constant 0 : index
    %c0_73 = arith.constant 0 : index
    %146 = vector.load %arg16[%c0_72, %c0_73] : memref<64x32xbf16, #tpu.memory_space<vmem>>, vector<64x32xbf16>
    %cst_74 = arith.constant dense<0.000000e+00> : vector<8x32xf32>
    %147 = tpu.matmul %145, %146, %cst_74 {dimension_numbers = #tpu.dot_dimension_numbers<[1], [0], [0], [1], [0, 0, 1, 1], [], []>} : vector<8x64xbf16>, vector<64x32xbf16>, vector<8x32xf32> -> vector<8x32xf32>
    %c0_75 = arith.constant 0 : index
    %c0_76 = arith.constant 0 : index
    %148 = vector.load %arg17[%c0_75, %c0_76] : memref<1x32xf32, #tpu.memory_space<vmem>>, vector<1x32xf32>
    %149 = vector.broadcast %148 : vector<1x32xf32> to vector<8x32xf32>
    %150 = arith.addf %147, %149 : vector<8x32xf32>
    %151 = arith.addf %113, %150 : vector<8x32xf32>
    %152 = vector.shape_cast %151 : vector<8x32xf32> to vector<1x8x32xf32>
    %c0_77 = arith.constant 0 : index
    %c0_78 = arith.constant 0 : index
    %c0_79 = arith.constant 0 : index
    %153 = vector.load %arg18[%c0_77, %c0_78, %c0_79] : memref<1x8x32xf32, #tpu.memory_space<vmem>>, vector<1x8x32xf32>
    tpu.vector_store %arg18[%c0_77, %c0_78, %c0_79], %152 {strides = array<i32>} : memref<1x8x32xf32, #tpu.memory_space<vmem>>, vector<1x8x32xf32>,
    return
  }
  func.func @transform_0(%arg0: i32) -> (i32, i32, i32) {
    %c0_i32 = arith.constant 0 : i32
    %c0_i32_0 = arith.constant 0 : i32
    %c0_i32_1 = arith.constant 0 : i32
    return %arg0, %c0_i32, %c0_i32_0 : i32, i32, i32
  }
  func.func @transform_1(%arg0: i32) -> (i32, i32, i32) {
    %c0_i32 = arith.constant 0 : i32
    %c0_i32_0 = arith.constant 0 : i32
    %c0_i32_1 = arith.constant 0 : i32
    return %arg0, %c0_i32, %c0_i32_0 : i32, i32, i32
  }
  func.func @transform_2(%arg0: i32) -> (i32, i32, i32) {
    %c0_i32 = arith.constant 0 : i32
    %c0_i32_0 = arith.constant 0 : i32
    %c0_i32_1 = arith.constant 0 : i32
    return %arg0, %c0_i32, %c0_i32_0 : i32, i32, i32
  }
  func.func @transform_3(%arg0: i32) -> (i32, i32) {
    %c0_i32 = arith.constant 0 : i32
    %c0_i32_0 = arith.constant 0 : i32
    %c0_i32_1 = arith.constant 0 : i32
    return %c0_i32, %c0_i32_0 : i32, i32
  }
  func.func @transform_4(%arg0: i32) -> (i32, i32) {
    %c0_i32 = arith.constant 0 : i32
    %c0_i32_0 = arith.constant 0 : i32
    %c0_i32_1 = arith.constant 0 : i32
    return %c0_i32, %c0_i32_0 : i32, i32
  }
  func.func @transform_5(%arg0: i32) -> (i32, i32) {
    %c0_i32 = arith.constant 0 : i32
    %c0_i32_0 = arith.constant 0 : i32
    %c0_i32_1 = arith.constant 0 : i32
    return %c0_i32, %c0_i32_0 : i32, i32
  }
  func.func @transform_6(%arg0: i32) -> (i32, i32) {
    %c0_i32 = arith.constant 0 : i32
    %c0_i32_0 = arith.constant 0 : i32
    %c0_i32_1 = arith.constant 0 : i32
    return %c0_i32, %c0_i32_0 : i32, i32
  }
  func.func @transform_7(%arg0: i32) -> (i32, i32) {
    %c0_i32 = arith.constant 0 : i32
    %c0_i32_0 = arith.constant 0 : i32
    %c0_i32_1 = arith.constant 0 : i32
    return %c0_i32, %c0_i32_0 : i32, i32
  }
  func.func @transform_8(%arg0: i32) -> (i32, i32) {
    %c0_i32 = arith.constant 0 : i32
    %c0_i32_0 = arith.constant 0 : i32
    %c0_i32_1 = arith.constant 0 : i32
    return %c0_i32, %c0_i32_0 : i32, i32
  }
  func.func @transform_9(%arg0: i32) -> (i32, i32) {
    %c0_i32 = arith.constant 0 : i32
    %c0_i32_0 = arith.constant 0 : i32
    %c0_i32_1 = arith.constant 0 : i32
    return %c0_i32, %c0_i32_0 : i32, i32
  }
  func.func @transform_10(%arg0: i32) -> (i32, i32) {
    %c0_i32 = arith.constant 0 : i32
    %c0_i32_0 = arith.constant 0 : i32
    %c0_i32_1 = arith.constant 0 : i32
    return %c0_i32, %c0_i32_0 : i32, i32
  }
  func.func @transform_11(%arg0: i32) -> (i32, i32) {
    %c0_i32 = arith.constant 0 : i32
    %c0_i32_0 = arith.constant 0 : i32
    %c0_i32_1 = arith.constant 0 : i32
    return %c0_i32, %c0_i32_0 : i32, i32
  }
  func.func @transform_12(%arg0: i32) -> (i32, i32) {
    %c0_i32 = arith.constant 0 : i32
    %c0_i32_0 = arith.constant 0 : i32
    %c0_i32_1 = arith.constant 0 : i32
    return %c0_i32, %c0_i32_0 : i32, i32
  }
  func.func @transform_13(%arg0: i32) -> (i32, i32) {
    %c0_i32 = arith.constant 0 : i32
    %c0_i32_0 = arith.constant 0 : i32
    %c0_i32_1 = arith.constant 0 : i32
    return %c0_i32, %c0_i32_0 : i32, i32
  }
  func.func @transform_14(%arg0: i32) -> (i32, i32) {
    %c0_i32 = arith.constant 0 : i32
    %c0_i32_0 = arith.constant 0 : i32
    %c0_i32_1 = arith.constant 0 : i32
    return %c0_i32, %c0_i32_0 : i32, i32
  }
  func.func @transform_15(%arg0: i32) -> (i32, i32) {
    %c0_i32 = arith.constant 0 : i32
    %c0_i32_0 = arith.constant 0 : i32
    %c0_i32_1 = arith.constant 0 : i32
    return %c0_i32, %c0_i32_0 : i32, i32
  }
  func.func @transform_16(%arg0: i32) -> (i32, i32) {
    %c0_i32 = arith.constant 0 : i32
    %c0_i32_0 = arith.constant 0 : i32
    %c0_i32_1 = arith.constant 0 : i32
    return %c0_i32, %c0_i32_0 : i32, i32
  }
  func.func @transform_17(%arg0: i32) -> (i32, i32, i32) {
    %c0_i32 = arith.constant 0 : i32
    %c0_i32_0 = arith.constant 0 : i32
    %c0_i32_1 = arith.constant 0 : i32
    return %arg0, %c0_i32, %c0_i32_0 : i32, i32, i32
  }
}

module attributes {stable_mosaic.version = 11 : i64} {
  func.func @_encoder_layer_kernel(%arg0: i32, %arg1: memref<1x8x32xbf16, #tpu.memory_space<vmem>>, %arg2: memref<1x8x32xbf16, #tpu.memory_space<vmem>>, %arg3: memref<1x8x8xbf16, #tpu.memory_space<vmem>>, %arg4: memref<32x32xbf16, #tpu.memory_space<vmem>>, %arg5: memref<1x32xf32, #tpu.memory_space<vmem>>, %arg6: memref<32x32xbf16, #tpu.memory_space<vmem>>, %arg7: memref<1x32xf32, #tpu.memory_space<vmem>>, %arg8: memref<32x32xbf16, #tpu.memory_space<vmem>>, %arg9: memref<1x32xf32, #tpu.memory_space<vmem>>, %arg10: memref<32x32xbf16, #tpu.memory_space<vmem>>, %arg11: memref<1x32xf32, #tpu.memory_space<vmem>>, %arg12: memref<1x32xf32, #tpu.memory_space<vmem>>, %arg13: memref<1x32xf32, #tpu.memory_space<vmem>>, %arg14: memref<32x64xbf16, #tpu.memory_space<vmem>>, %arg15: memref<1x64xf32, #tpu.memory_space<vmem>>, %arg16: memref<64x32xbf16, #tpu.memory_space<vmem>>, %arg17: memref<1x32xf32, #tpu.memory_space<vmem>>, %arg18: memref<1x8x32xf32, #tpu.memory_space<vmem>>, %arg19: memref<1x8x32xbf16, #tpu.memory_space<vmem>>) attributes {dimension_semantics = [#tpu.dimension_semantics<parallel>], iteration_bounds = array<i64: 2>, scalar_prefetch = 0 : i64, scratch_operands = 1 : i64, tpu.core_type = #tpu.core_type<tc>, window_params = [{transform_indices = @transform_0, window_bounds = array<i64: 1, 8, 32>}, {transform_indices = @transform_1, window_bounds = array<i64: 1, 8, 32>}, {transform_indices = @transform_2, window_bounds = array<i64: 1, 8, 8>}, {pipeline_mode = #tpu.pipeline_mode<synchronous>, transform_indices = @transform_3, window_bounds = array<i64: 32, 32>}, {pipeline_mode = #tpu.pipeline_mode<synchronous>, transform_indices = @transform_4, window_bounds = array<i64: 1, 32>}, {pipeline_mode = #tpu.pipeline_mode<synchronous>, transform_indices = @transform_5, window_bounds = array<i64: 32, 32>}, {pipeline_mode = #tpu.pipeline_mode<synchronous>, transform_indices = @transform_6, window_bounds = array<i64: 1, 32>}, {pipeline_mode = #tpu.pipeline_mode<synchronous>, transform_indices = @transform_7, window_bounds = array<i64: 32, 32>}, {pipeline_mode = #tpu.pipeline_mode<synchronous>, transform_indices = @transform_8, window_bounds = array<i64: 1, 32>}, {pipeline_mode = #tpu.pipeline_mode<synchronous>, transform_indices = @transform_9, window_bounds = array<i64: 32, 32>}, {pipeline_mode = #tpu.pipeline_mode<synchronous>, transform_indices = @transform_10, window_bounds = array<i64: 1, 32>}, {pipeline_mode = #tpu.pipeline_mode<synchronous>, transform_indices = @transform_11, window_bounds = array<i64: 1, 32>}, {pipeline_mode = #tpu.pipeline_mode<synchronous>, transform_indices = @transform_12, window_bounds = array<i64: 1, 32>}, {pipeline_mode = #tpu.pipeline_mode<synchronous>, transform_indices = @transform_13, window_bounds = array<i64: 32, 64>}, {pipeline_mode = #tpu.pipeline_mode<synchronous>, transform_indices = @transform_14, window_bounds = array<i64: 1, 64>}, {pipeline_mode = #tpu.pipeline_mode<synchronous>, transform_indices = @transform_15, window_bounds = array<i64: 64, 32>}, {pipeline_mode = #tpu.pipeline_mode<synchronous>, transform_indices = @transform_16, window_bounds = array<i64: 1, 32>}, {transform_indices = @transform_17, window_bounds = array<i64: 1, 8, 32>}]} {
    %c0 = arith.constant 0 : index
    %c0_0 = arith.constant 0 : index
    %c0_1 = arith.constant 0 : index
    %0 = vector.load %arg1[%c0, %c0_0, %c0_1] : memref<1x8x32xbf16, #tpu.memory_space<vmem>>, vector<1x8x32xbf16>
    %1 = vector.shape_cast %0 : vector<1x8x32xbf16> to vector<8x32xbf16>
    %c0_2 = arith.constant 0 : index
    %c0_3 = arith.constant 0 : index
    %c0_4 = arith.constant 0 : index
    %2 = vector.load %arg2[%c0_2, %c0_3, %c0_4] : memref<1x8x32xbf16, #tpu.memory_space<vmem>>, vector<1x8x32xbf16>
    %3 = vector.shape_cast %2 : vector<1x8x32xbf16> to vector<8x32xbf16>
    %c0_5 = arith.constant 0 : index
    %c0_6 = arith.constant 0 : index
    %4 = vector.load %arg4[%c0_5, %c0_6] : memref<32x32xbf16, #tpu.memory_space<vmem>>, vector<32x32xbf16>
    %cst = arith.constant dense<0.000000e+00> : vector<8x32xf32>
    %5 = tpu.matmul %1, %4, %cst {dimension_numbers = #tpu.dot_dimension_numbers<[1], [0], [0], [1], [0, 0, 1, 1], [], []>} : vector<8x32xbf16>, vector<32x32xbf16>, vector<8x32xf32> -> vector<8x32xf32>
    %c0_7 = arith.constant 0 : index
    %c0_8 = arith.constant 0 : index
    %6 = vector.load %arg5[%c0_7, %c0_8] : memref<1x32xf32, #tpu.memory_space<vmem>>, vector<1x32xf32>
    %7 = vector.broadcast %6 : vector<1x32xf32> to vector<8x32xf32>
    %8 = arith.addf %5, %7 : vector<8x32xf32>
    %cst_9 = arith.constant 0.353553385 : f32
    %9 = vector.broadcast %cst_9 : f32 to vector<8x32xf32>
    %10 = arith.mulf %8, %9 : vector<8x32xf32>
    %11 = arith.truncf %10 : vector<8x32xf32> to vector<8x32xbf16>
    %12 = vector.shape_cast %11 : vector<8x32xbf16> to vector<1x8x32xbf16>
    %c0_10 = arith.constant 0 : index
    %c0_11 = arith.constant 0 : index
    %13 = vector.load %arg6[%c0_10, %c0_11] : memref<32x32xbf16, #tpu.memory_space<vmem>>, vector<32x32xbf16>
    %cst_12 = arith.constant dense<0.000000e+00> : vector<8x32xf32>
    %14 = tpu.matmul %3, %13, %cst_12 {dimension_numbers = #tpu.dot_dimension_numbers<[1], [0], [0], [1], [0, 0, 1, 1], [], []>} : vector<8x32xbf16>, vector<32x32xbf16>, vector<8x32xf32> -> vector<8x32xf32>
    %c0_13 = arith.constant 0 : index
    %c0_14 = arith.constant 0 : index
    %15 = vector.load %arg7[%c0_13, %c0_14] : memref<1x32xf32, #tpu.memory_space<vmem>>, vector<1x32xf32>
    %16 = vector.broadcast %15 : vector<1x32xf32> to vector<8x32xf32>
    %17 = arith.addf %14, %16 : vector<8x32xf32>
    %18 = arith.truncf %17 : vector<8x32xf32> to vector<8x32xbf16>
    %19 = vector.shape_cast %18 : vector<8x32xbf16> to vector<1x8x32xbf16>
    %c0_15 = arith.constant 0 : index
    %c0_16 = arith.constant 0 : index
    %20 = vector.load %arg8[%c0_15, %c0_16] : memref<32x32xbf16, #tpu.memory_space<vmem>>, vector<32x32xbf16>
    %cst_17 = arith.constant dense<0.000000e+00> : vector<8x32xf32>
    %21 = tpu.matmul %3, %20, %cst_17 {dimension_numbers = #tpu.dot_dimension_numbers<[1], [0], [0], [1], [0, 0, 1, 1], [], []>} : vector<8x32xbf16>, vector<32x32xbf16>, vector<8x32xf32> -> vector<8x32xf32>
    %c0_18 = arith.constant 0 : index
    %c0_19 = arith.constant 0 : index
    %22 = vector.load %arg9[%c0_18, %c0_19] : memref<1x32xf32, #tpu.memory_space<vmem>>, vector<1x32xf32>
    %23 = vector.broadcast %22 : vector<1x32xf32> to vector<8x32xf32>
    %24 = arith.addf %21, %23 : vector<8x32xf32>
    %25 = arith.truncf %24 : vector<8x32xf32> to vector<8x32xbf16>
    %26 = vector.shape_cast %25 : vector<8x32xbf16> to vector<1x8x32xbf16>
    %c0_20 = arith.constant 0 : index
    %c0_21 = arith.constant 0 : index
    %c0_22 = arith.constant 0 : index
    %27 = vector.load %arg3[%c0_20, %c0_21, %c0_22] : memref<1x8x8xbf16, #tpu.memory_space<vmem>>, vector<1x8x8xbf16>
    %28 = arith.extf %27 : vector<1x8x8xbf16> to vector<1x8x8xf32>
    %cst_23 = arith.constant -1.000000e+09 : f32
    %29 = vector.broadcast %cst_23 : f32 to vector<1x8x8xf32>
    %30 = arith.mulf %28, %29 : vector<1x8x8xf32>
    %31 = vector.extract_strided_slice %12 {offsets = [0, 0, 0], sizes = [1, 8, 8], strides = [1, 1, 1]} : vector<1x8x32xbf16> to vector<1x8x8xbf16>
    %32 = vector.extract_strided_slice %19 {offsets = [0, 0, 0], sizes = [1, 8, 8], strides = [1, 1, 1]} : vector<1x8x32xbf16> to vector<1x8x8xbf16>
    %33 = vector.extract_strided_slice %26 {offsets = [0, 0, 0], sizes = [1, 8, 8], strides = [1, 1, 1]} : vector<1x8x32xbf16> to vector<1x8x8xbf16>
    "tpu.trace_start"() <{level = 10 : i32, message = "bqd,bkd->bqk"}> : () -> ()
    %cst_24 = arith.constant dense<0.000000e+00> : vector<1x8x8xf32>
    %34 = tpu.matmul %31, %32, %cst_24 {dimension_numbers = #tpu.dot_dimension_numbers<[2], [2], [1], [1], [0, 0, 0, 1, 1, 1], [0], [0]>} : vector<1x8x8xbf16>, vector<1x8x8xbf16>, vector<1x8x8xf32> -> vector<1x8x8xf32>
    "tpu.trace_stop"() : () -> ()
    %35 = arith.addf %34, %30 : vector<1x8x8xf32>
    %cst_25 = arith.constant dense<0xFF800000> : vector<1x8xf32>
    %36 = vector.multi_reduction <maximumf>, %35, %cst_25 [2] : vector<1x8x8xf32> to vector<1x8xf32>
    %37 = vector.shape_cast %36 : vector<1x8xf32> to vector<1x8x1xf32>
    %38 = vector.broadcast %37 : vector<1x8x1xf32> to vector<1x8x8xf32>
    %39 = arith.subf %35, %38 : vector<1x8x8xf32>
    %40 = math.exp %39 : vector<1x8x8xf32>
    %cst_26 = arith.constant dense<0.000000e+00> : vector<1x8xf32>
    %41 = vector.multi_reduction <add>, %40, %cst_26 [2] : vector<1x8x8xf32> to vector<1x8xf32>
    %42 = vector.shape_cast %41 : vector<1x8xf32> to vector<1x8x1xf32>
    %43 = tpu.reciprocal %42 {approx = true} : vector<1x8x1xf32> -> vector<1x8x1xf32>
    %44 = vector.broadcast %43 : vector<1x8x1xf32> to vector<1x8x8xf32>
    %45 = arith.mulf %40, %44 : vector<1x8x8xf32>
    %46 = arith.truncf %45 : vector<1x8x8xf32> to vector<1x8x8xbf16>
    "tpu.trace_start"() <{level = 10 : i32, message = "bqk,bkd->bqd"}> : () -> ()
    %cst_27 = arith.constant dense<0.000000e+00> : vector<1x8x8xf32>
    %47 = tpu.matmul %46, %33, %cst_27 {dimension_numbers = #tpu.dot_dimension_numbers<[2], [1], [1], [2], [0, 0, 0, 1, 1, 2], [0], [0]>} : vector<1x8x8xbf16>, vector<1x8x8xbf16>, vector<1x8x8xf32> -> vector<1x8x8xf32>
    "tpu.trace_stop"() : () -> ()
    %48 = arith.truncf %47 : vector<1x8x8xf32> to vector<1x8x8xbf16>
    %c0_28 = arith.constant 0 : index
    %c0_29 = arith.constant 0 : index
    %c0_30 = arith.constant 0 : index
    %49 = vector.load %arg19[%c0_28, %c0_29, %c0_30] : memref<1x8x32xbf16, #tpu.memory_space<vmem>>, vector<1x8x8xbf16>
    tpu.vector_store %arg19[%c0_28, %c0_29, %c0_30], %48 {strides = array<i32>} : memref<1x8x32xbf16, #tpu.memory_space<vmem>>, vector<1x8x8xbf16>,
    %50 = vector.extract_strided_slice %12 {offsets = [0, 0, 8], sizes = [1, 8, 8], strides = [1, 1, 1]} : vector<1x8x32xbf16> to vector<1x8x8xbf16>
    %51 = vector.extract_strided_slice %19 {offsets = [0, 0, 8], sizes = [1, 8, 8], strides = [1, 1, 1]} : vector<1x8x32xbf16> to vector<1x8x8xbf16>
    %52 = vector.extract_strided_slice %26 {offsets = [0, 0, 8], sizes = [1, 8, 8], strides = [1, 1, 1]} : vector<1x8x32xbf16> to vector<1x8x8xbf16>
    "tpu.trace_start"() <{level = 10 : i32, message = "bqd,bkd->bqk"}> : () -> ()
    %cst_31 = arith.constant dense<0.000000e+00> : vector<1x8x8xf32>
    %53 = tpu.matmul %50, %51, %cst_31 {dimension_numbers = #tpu.dot_dimension_numbers<[2], [2], [1], [1], [0, 0, 0, 1, 1, 1], [0], [0]>} : vector<1x8x8xbf16>, vector<1x8x8xbf16>, vector<1x8x8xf32> -> vector<1x8x8xf32>
    "tpu.trace_stop"() : () -> ()
    %54 = arith.addf %53, %30 : vector<1x8x8xf32>
    %cst_32 = arith.constant dense<0xFF800000> : vector<1x8xf32>
    %55 = vector.multi_reduction <maximumf>, %54, %cst_32 [2] : vector<1x8x8xf32> to vector<1x8xf32>
    %56 = vector.shape_cast %55 : vector<1x8xf32> to vector<1x8x1xf32>
    %57 = vector.broadcast %56 : vector<1x8x1xf32> to vector<1x8x8xf32>
    %58 = arith.subf %54, %57 : vector<1x8x8xf32>
    %59 = math.exp %58 : vector<1x8x8xf32>
    %cst_33 = arith.constant dense<0.000000e+00> : vector<1x8xf32>
    %60 = vector.multi_reduction <add>, %59, %cst_33 [2] : vector<1x8x8xf32> to vector<1x8xf32>
    %61 = vector.shape_cast %60 : vector<1x8xf32> to vector<1x8x1xf32>
    %62 = tpu.reciprocal %61 {approx = true} : vector<1x8x1xf32> -> vector<1x8x1xf32>
    %63 = vector.broadcast %62 : vector<1x8x1xf32> to vector<1x8x8xf32>
    %64 = arith.mulf %59, %63 : vector<1x8x8xf32>
    %65 = arith.truncf %64 : vector<1x8x8xf32> to vector<1x8x8xbf16>
    "tpu.trace_start"() <{level = 10 : i32, message = "bqk,bkd->bqd"}> : () -> ()
    %cst_34 = arith.constant dense<0.000000e+00> : vector<1x8x8xf32>
    %66 = tpu.matmul %65, %52, %cst_34 {dimension_numbers = #tpu.dot_dimension_numbers<[2], [1], [1], [2], [0, 0, 0, 1, 1, 2], [0], [0]>} : vector<1x8x8xbf16>, vector<1x8x8xbf16>, vector<1x8x8xf32> -> vector<1x8x8xf32>
    "tpu.trace_stop"() : () -> ()
    %67 = arith.truncf %66 : vector<1x8x8xf32> to vector<1x8x8xbf16>
    %c0_35 = arith.constant 0 : index
    %c0_36 = arith.constant 0 : index
    %c8 = arith.constant 8 : index
    %68 = vector.load %arg19[%c0_35, %c0_36, %c8] : memref<1x8x32xbf16, #tpu.memory_space<vmem>>, vector<1x8x8xbf16>
    tpu.vector_store %arg19[%c0_35, %c0_36, %c8], %67 {strides = array<i32>} : memref<1x8x32xbf16, #tpu.memory_space<vmem>>, vector<1x8x8xbf16>,
    %69 = vector.extract_strided_slice %12 {offsets = [0, 0, 16], sizes = [1, 8, 8], strides = [1, 1, 1]} : vector<1x8x32xbf16> to vector<1x8x8xbf16>
    %70 = vector.extract_strided_slice %19 {offsets = [0, 0, 16], sizes = [1, 8, 8], strides = [1, 1, 1]} : vector<1x8x32xbf16> to vector<1x8x8xbf16>
    %71 = vector.extract_strided_slice %26 {offsets = [0, 0, 16], sizes = [1, 8, 8], strides = [1, 1, 1]} : vector<1x8x32xbf16> to vector<1x8x8xbf16>
    "tpu.trace_start"() <{level = 10 : i32, message = "bqd,bkd->bqk"}> : () -> ()
    %cst_37 = arith.constant dense<0.000000e+00> : vector<1x8x8xf32>
    %72 = tpu.matmul %69, %70, %cst_37 {dimension_numbers = #tpu.dot_dimension_numbers<[2], [2], [1], [1], [0, 0, 0, 1, 1, 1], [0], [0]>} : vector<1x8x8xbf16>, vector<1x8x8xbf16>, vector<1x8x8xf32> -> vector<1x8x8xf32>
    "tpu.trace_stop"() : () -> ()
    %73 = arith.addf %72, %30 : vector<1x8x8xf32>
    %cst_38 = arith.constant dense<0xFF800000> : vector<1x8xf32>
    %74 = vector.multi_reduction <maximumf>, %73, %cst_38 [2] : vector<1x8x8xf32> to vector<1x8xf32>
    %75 = vector.shape_cast %74 : vector<1x8xf32> to vector<1x8x1xf32>
    %76 = vector.broadcast %75 : vector<1x8x1xf32> to vector<1x8x8xf32>
    %77 = arith.subf %73, %76 : vector<1x8x8xf32>
    %78 = math.exp %77 : vector<1x8x8xf32>
    %cst_39 = arith.constant dense<0.000000e+00> : vector<1x8xf32>
    %79 = vector.multi_reduction <add>, %78, %cst_39 [2] : vector<1x8x8xf32> to vector<1x8xf32>
    %80 = vector.shape_cast %79 : vector<1x8xf32> to vector<1x8x1xf32>
    %81 = tpu.reciprocal %80 {approx = true} : vector<1x8x1xf32> -> vector<1x8x1xf32>
    %82 = vector.broadcast %81 : vector<1x8x1xf32> to vector<1x8x8xf32>
    %83 = arith.mulf %78, %82 : vector<1x8x8xf32>
    %84 = arith.truncf %83 : vector<1x8x8xf32> to vector<1x8x8xbf16>
    "tpu.trace_start"() <{level = 10 : i32, message = "bqk,bkd->bqd"}> : () -> ()
    %cst_40 = arith.constant dense<0.000000e+00> : vector<1x8x8xf32>
    %85 = tpu.matmul %84, %71, %cst_40 {dimension_numbers = #tpu.dot_dimension_numbers<[2], [1], [1], [2], [0, 0, 0, 1, 1, 2], [0], [0]>} : vector<1x8x8xbf16>, vector<1x8x8xbf16>, vector<1x8x8xf32> -> vector<1x8x8xf32>
    "tpu.trace_stop"() : () -> ()
    %86 = arith.truncf %85 : vector<1x8x8xf32> to vector<1x8x8xbf16>
    %c0_41 = arith.constant 0 : index
    %c0_42 = arith.constant 0 : index
    %c16 = arith.constant 16 : index
    %87 = vector.load %arg19[%c0_41, %c0_42, %c16] : memref<1x8x32xbf16, #tpu.memory_space<vmem>>, vector<1x8x8xbf16>
    tpu.vector_store %arg19[%c0_41, %c0_42, %c16], %86 {strides = array<i32>} : memref<1x8x32xbf16, #tpu.memory_space<vmem>>, vector<1x8x8xbf16>,
    %88 = vector.extract_strided_slice %12 {offsets = [0, 0, 24], sizes = [1, 8, 8], strides = [1, 1, 1]} : vector<1x8x32xbf16> to vector<1x8x8xbf16>
    %89 = vector.extract_strided_slice %19 {offsets = [0, 0, 24], sizes = [1, 8, 8], strides = [1, 1, 1]} : vector<1x8x32xbf16> to vector<1x8x8xbf16>
    %90 = vector.extract_strided_slice %26 {offsets = [0, 0, 24], sizes = [1, 8, 8], strides = [1, 1, 1]} : vector<1x8x32xbf16> to vector<1x8x8xbf16>
    "tpu.trace_start"() <{level = 10 : i32, message = "bqd,bkd->bqk"}> : () -> ()
    %cst_43 = arith.constant dense<0.000000e+00> : vector<1x8x8xf32>
    %91 = tpu.matmul %88, %89, %cst_43 {dimension_numbers = #tpu.dot_dimension_numbers<[2], [2], [1], [1], [0, 0, 0, 1, 1, 1], [0], [0]>} : vector<1x8x8xbf16>, vector<1x8x8xbf16>, vector<1x8x8xf32> -> vector<1x8x8xf32>
    "tpu.trace_stop"() : () -> ()
    %92 = arith.addf %91, %30 : vector<1x8x8xf32>
    %cst_44 = arith.constant dense<0xFF800000> : vector<1x8xf32>
    %93 = vector.multi_reduction <maximumf>, %92, %cst_44 [2] : vector<1x8x8xf32> to vector<1x8xf32>
    %94 = vector.shape_cast %93 : vector<1x8xf32> to vector<1x8x1xf32>
    %95 = vector.broadcast %94 : vector<1x8x1xf32> to vector<1x8x8xf32>
    %96 = arith.subf %92, %95 : vector<1x8x8xf32>
    %97 = math.exp %96 : vector<1x8x8xf32>
    %cst_45 = arith.constant dense<0.000000e+00> : vector<1x8xf32>
    %98 = vector.multi_reduction <add>, %97, %cst_45 [2] : vector<1x8x8xf32> to vector<1x8xf32>
    %99 = vector.shape_cast %98 : vector<1x8xf32> to vector<1x8x1xf32>
    %100 = tpu.reciprocal %99 {approx = true} : vector<1x8x1xf32> -> vector<1x8x1xf32>
    %101 = vector.broadcast %100 : vector<1x8x1xf32> to vector<1x8x8xf32>
    %102 = arith.mulf %97, %101 : vector<1x8x8xf32>
    %103 = arith.truncf %102 : vector<1x8x8xf32> to vector<1x8x8xbf16>
    "tpu.trace_start"() <{level = 10 : i32, message = "bqk,bkd->bqd"}> : () -> ()
    %cst_46 = arith.constant dense<0.000000e+00> : vector<1x8x8xf32>
    %104 = tpu.matmul %103, %90, %cst_46 {dimension_numbers = #tpu.dot_dimension_numbers<[2], [1], [1], [2], [0, 0, 0, 1, 1, 2], [0], [0]>} : vector<1x8x8xbf16>, vector<1x8x8xbf16>, vector<1x8x8xf32> -> vector<1x8x8xf32>
    "tpu.trace_stop"() : () -> ()
    %105 = arith.truncf %104 : vector<1x8x8xf32> to vector<1x8x8xbf16>
    %c0_47 = arith.constant 0 : index
    %c0_48 = arith.constant 0 : index
    %c24 = arith.constant 24 : index
    %106 = vector.load %arg19[%c0_47, %c0_48, %c24] : memref<1x8x32xbf16, #tpu.memory_space<vmem>>, vector<1x8x8xbf16>
    tpu.vector_store %arg19[%c0_47, %c0_48, %c24], %105 {strides = array<i32>} : memref<1x8x32xbf16, #tpu.memory_space<vmem>>, vector<1x8x8xbf16>,
    %c0_49 = arith.constant 0 : index
    %c0_50 = arith.constant 0 : index
    %c0_51 = arith.constant 0 : index
    %107 = vector.load %arg19[%c0_49, %c0_50, %c0_51] : memref<1x8x32xbf16, #tpu.memory_space<vmem>>, vector<1x8x32xbf16>
    %108 = vector.shape_cast %107 : vector<1x8x32xbf16> to vector<8x32xbf16>
    %c0_52 = arith.constant 0 : index
    %c0_53 = arith.constant 0 : index
    %109 = vector.load %arg10[%c0_52, %c0_53] : memref<32x32xbf16, #tpu.memory_space<vmem>>, vector<32x32xbf16>
    %cst_54 = arith.constant dense<0.000000e+00> : vector<8x32xf32>
    %110 = tpu.matmul %108, %109, %cst_54 {dimension_numbers = #tpu.dot_dimension_numbers<[1], [0], [0], [1], [0, 0, 1, 1], [], []>} : vector<8x32xbf16>, vector<32x32xbf16>, vector<8x32xf32> -> vector<8x32xf32>
    %c0_55 = arith.constant 0 : index
    %c0_56 = arith.constant 0 : index
    %111 = vector.load %arg11[%c0_55, %c0_56] : memref<1x32xf32, #tpu.memory_space<vmem>>, vector<1x32xf32>
    %112 = vector.broadcast %111 : vector<1x32xf32> to vector<8x32xf32>
    %113 = arith.addf %110, %112 : vector<8x32xf32>
    %cst_57 = arith.constant dense<0.000000e+00> : vector<8xf32>
    %114 = vector.multi_reduction <add>, %113, %cst_57 [1] : vector<8x32xf32> to vector<8xf32>
    %115 = vector.shape_cast %114 : vector<8xf32> to vector<8x1xf32>
    %cst_58 = arith.constant 3.200000e+01 : f32
    %116 = vector.broadcast %cst_58 : f32 to vector<8x1xf32>
    %117 = arith.divf %115, %116 : vector<8x1xf32>
    %118 = vector.broadcast %117 : vector<8x1xf32> to vector<8x32xf32>
    %119 = arith.subf %113, %118 : vector<8x32xf32>
    %120 = arith.mulf %119, %119 : vector<8x32xf32>
    %cst_59 = arith.constant dense<0.000000e+00> : vector<8xf32>
    %121 = vector.multi_reduction <add>, %120, %cst_59 [1] : vector<8x32xf32> to vector<8xf32>
    %122 = vector.shape_cast %121 : vector<8xf32> to vector<8x1xf32>
    %cst_60 = arith.constant 0.0322580636 : f32
    %123 = vector.broadcast %cst_60 : f32 to vector<8x1xf32>
    %124 = arith.mulf %122, %123 : vector<8x1xf32>
    %125 = math.sqrt %124 : vector<8x1xf32>
    %cst_61 = arith.constant 9.99999997E-7 : f32
    %126 = vector.broadcast %cst_61 : f32 to vector<8x1xf32>
    %127 = arith.addf %125, %126 : vector<8x1xf32>
    %128 = tpu.reciprocal %127 {approx = true} : vector<8x1xf32> -> vector<8x1xf32>
    %c0_62 = arith.constant 0 : index
    %c0_63 = arith.constant 0 : index
    %129 = vector.load %arg12[%c0_62, %c0_63] : memref<1x32xf32, #tpu.memory_space<vmem>>, vector<1x32xf32>
    %130 = vector.broadcast %129 : vector<1x32xf32> to vector<8x32xf32>
    %131 = arith.mulf %130, %119 : vector<8x32xf32>
    %132 = vector.broadcast %128 : vector<8x1xf32> to vector<8x32xf32>
    %133 = arith.mulf %131, %132 : vector<8x32xf32>
    %c0_64 = arith.constant 0 : index
    %c0_65 = arith.constant 0 : index
    %134 = vector.load %arg13[%c0_64, %c0_65] : memref<1x32xf32, #tpu.memory_space<vmem>>, vector<1x32xf32>
    %135 = vector.broadcast %134 : vector<1x32xf32> to vector<8x32xf32>
    %136 = arith.addf %133, %135 : vector<8x32xf32>
    %137 = arith.truncf %136 : vector<8x32xf32> to vector<8x32xbf16>
    %c0_66 = arith.constant 0 : index
    %c0_67 = arith.constant 0 : index
    %138 = vector.load %arg14[%c0_66, %c0_67] : memref<32x64xbf16, #tpu.memory_space<vmem>>, vector<32x64xbf16>
    %cst_68 = arith.constant dense<0.000000e+00> : vector<8x64xf32>
    %139 = tpu.matmul %137, %138, %cst_68 {dimension_numbers = #tpu.dot_dimension_numbers<[1], [0], [0], [1], [0, 0, 1, 1], [], []>} : vector<8x32xbf16>, vector<32x64xbf16>, vector<8x64xf32> -> vector<8x64xf32>
    %c0_69 = arith.constant 0 : index
    %c0_70 = arith.constant 0 : index
    %140 = vector.load %arg15[%c0_69, %c0_70] : memref<1x64xf32, #tpu.memory_space<vmem>>, vector<1x64xf32>
    %141 = vector.broadcast %140 : vector<1x64xf32> to vector<8x64xf32>
    %142 = arith.addf %139, %141 : vector<8x64xf32>
    %cst_71 = arith.constant 0.000000e+00 : f32
    %143 = vector.broadcast %cst_71 : f32 to vector<8x64xf32>
    %144 = arith.maximumf %142, %143 : vector<8x64xf32>
    %145 = arith.truncf %144 : vector<8x64xf32> to vector<8x64xbf16>
    %c0_72 = arith.constant 0 : index
    %c0_73 = arith.constant 0 : index
    %146 = vector.load %arg16[%c0_72, %c0_73] : memref<64x32xbf16, #tpu.memory_space<vmem>>, vector<64x32xbf16>
    %cst_74 = arith.constant dense<0.000000e+00> : vector<8x32xf32>
    %147 = tpu.matmul %145, %146, %cst_74 {dimension_numbers = #tpu.dot_dimension_numbers<[1], [0], [0], [1], [0, 0, 1, 1], [], []>} : vector<8x64xbf16>, vector<64x32xbf16>, vector<8x32xf32> -> vector<8x32xf32>
    %c0_75 = arith.constant 0 : index
    %c0_76 = arith.constant 0 : index
    %148 = vector.load %arg17[%c0_75, %c0_76] : memref<1x32xf32, #tpu.memory_space<vmem>>, vector<1x32xf32>
    %149 = vector.broadcast %148 : vector<1x32xf32> to vector<8x32xf32>
    %150 = arith.addf %147, %149 : vector<8x32xf32>
    %151 = arith.addf %113, %150 : vector<8x32xf32>
    %152 = vector.shape_cast %151 : vector<8x32xf32> to vector<1x8x32xf32>
    %c0_77 = arith.constant 0 : index
    %c0_78 = arith.constant 0 : index
    %c0_79 = arith.constant 0 : index
    %153 = vector.load %arg18[%c0_77, %c0_78, %c0_79] : memref<1x8x32xf32, #tpu.memory_space<vmem>>, vector<1x8x32xf32>
    tpu.vector_store %arg18[%c0_77, %c0_78, %c0_79], %152 {strides = array<i32>} : memref<1x8x32xf32, #tpu.memory_space<vmem>>, vector<1x8x32xf32>,
    return
  }
  func.func @transform_0(%arg0: i32) -> (i32, i32, i32) {
    %c0_i32 = arith.constant 0 : i32
    %c0_i32_0 = arith.constant 0 : i32
    %c0_i32_1 = arith.constant 0 : i32
    return %arg0, %c0_i32, %c0_i32_0 : i32, i32, i32
  }
  func.func @transform_1(%arg0: i32) -> (i32, i32, i32) {
    %c0_i32 = arith.constant 0 : i32
    %c0_i32_0 = arith.constant 0 : i32
    %c0_i32_1 = arith.constant 0 : i32
    return %arg0, %c0_i32, %c0_i32_0 : i32, i32, i32
  }
  func.func @transform_2(%arg0: i32) -> (i32, i32, i32) {
    %c0_i32 = arith.constant 0 : i32
    %c0_i32_0 = arith.constant 0 : i32
    %c0_i32_1 = arith.constant 0 : i32
    return %arg0, %c0_i32, %c0_i32_0 : i32, i32, i32
  }
  func.func @transform_3(%arg0: i32) -> (i32, i32) {
    %c0_i32 = arith.constant 0 : i32
    %c0_i32_0 = arith.constant 0 : i32
    %c0_i32_1 = arith.constant 0 : i32
    return %c0_i32, %c0_i32_0 : i32, i32
  }
  func.func @transform_4(%arg0: i32) -> (i32, i32) {
    %c0_i32 = arith.constant 0 : i32
    %c0_i32_0 = arith.constant 0 : i32
    %c0_i32_1 = arith.constant 0 : i32
    return %c0_i32, %c0_i32_0 : i32, i32
  }
  func.func @transform_5(%arg0: i32) -> (i32, i32) {
    %c0_i32 = arith.constant 0 : i32
    %c0_i32_0 = arith.constant 0 : i32
    %c0_i32_1 = arith.constant 0 : i32
    return %c0_i32, %c0_i32_0 : i32, i32
  }
  func.func @transform_6(%arg0: i32) -> (i32, i32) {
    %c0_i32 = arith.constant 0 : i32
    %c0_i32_0 = arith.constant 0 : i32
    %c0_i32_1 = arith.constant 0 : i32
    return %c0_i32, %c0_i32_0 : i32, i32
  }
  func.func @transform_7(%arg0: i32) -> (i32, i32) {
    %c0_i32 = arith.constant 0 : i32
    %c0_i32_0 = arith.constant 0 : i32
    %c0_i32_1 = arith.constant 0 : i32
    return %c0_i32, %c0_i32_0 : i32, i32
  }
  func.func @transform_8(%arg0: i32) -> (i32, i32) {
    %c0_i32 = arith.constant 0 : i32
    %c0_i32_0 = arith.constant 0 : i32
    %c0_i32_1 = arith.constant 0 : i32
    return %c0_i32, %c0_i32_0 : i32, i32
  }
  func.func @transform_9(%arg0: i32) -> (i32, i32) {
    %c0_i32 = arith.constant 0 : i32
    %c0_i32_0 = arith.constant 0 : i32
    %c0_i32_1 = arith.constant 0 : i32
    return %c0_i32, %c0_i32_0 : i32, i32
  }
  func.func @transform_10(%arg0: i32) -> (i32, i32) {
    %c0_i32 = arith.constant 0 : i32
    %c0_i32_0 = arith.constant 0 : i32
    %c0_i32_1 = arith.constant 0 : i32
    return %c0_i32, %c0_i32_0 : i32, i32
  }
  func.func @transform_11(%arg0: i32) -> (i32, i32) {
    %c0_i32 = arith.constant 0 : i32
    %c0_i32_0 = arith.constant 0 : i32
    %c0_i32_1 = arith.constant 0 : i32
    return %c0_i32, %c0_i32_0 : i32, i32
  }
  func.func @transform_12(%arg0: i32) -> (i32, i32) {
    %c0_i32 = arith.constant 0 : i32
    %c0_i32_0 = arith.constant 0 : i32
    %c0_i32_1 = arith.constant 0 : i32
    return %c0_i32, %c0_i32_0 : i32, i32
  }
  func.func @transform_13(%arg0: i32) -> (i32, i32) {
    %c0_i32 = arith.constant 0 : i32
    %c0_i32_0 = arith.constant 0 : i32
    %c0_i32_1 = arith.constant 0 : i32
    return %c0_i32, %c0_i32_0 : i32, i32
  }
  func.func @transform_14(%arg0: i32) -> (i32, i32) {
    %c0_i32 = arith.constant 0 : i32
    %c0_i32_0 = arith.constant 0 : i32
    %c0_i32_1 = arith.constant 0 : i32
    return %c0_i32, %c0_i32_0 : i32, i32
  }
  func.func @transform_15(%arg0: i32) -> (i32, i32) {
    %c0_i32 = arith.constant 0 : i32
    %c0_i32_0 = arith.constant 0 : i32
    %c0_i32_1 = arith.constant 0 : i32
    return %c0_i32, %c0_i32_0 : i32, i32
  }
  func.func @transform_16(%arg0: i32) -> (i32, i32) {
    %c0_i32 = arith.constant 0 : i32
    %c0_i32_0 = arith.constant 0 : i32
    %c0_i32_1 = arith.constant 0 : i32
    return %c0_i32, %c0_i32_0 : i32, i32
  }
  func.func @transform_17(%arg0: i32) -> (i32, i32, i32) {
    %c0_i32 = arith.constant 0 : i32
    %c0_i32_0 = arith.constant 0 : i32
    %c0_i32_1 = arith.constant 0 : i32
    return %arg0, %c0_i32, %c0_i32_0 : i32, i32, i32
  }
}

</mosaic_0001>

<bundles_post_ra>
// kernel: tpu_custom_call.1
= control target key start
LH: loop header
LB: loop body
LE: loop exit
PB: predicated region body
PF: predicated region fallthrough
CT: control target
= control target key end

     0   :  { %s2229_s0 = inlined_call_operand.hbm [shape: bf16[2,8,32], index: 0, kind: input, shape index: {}]   ;;  %s2230_s1 = inlined_call_operand.hbm [shape: bf16[2,8,32], index: 1, kind: input, shape index: {}]   ;;  %s2231_s2 = inlined_call_operand.hbm [shape: bf16[2,8,8], index: 2, kind: input, shape index: {}]   ;;  %s2232_s3 = inlined_call_operand.vmem [shape: bf16[32,32], index: 3, kind: input, shape index: {}]   ;;  %s2233_s4 = inlined_call_operand.vmem [shape: f32[1,32], index: 4, kind: input, shape index: {}]   ;;  %s2234_s5 = inlined_call_operand.vmem [shape: bf16[32,32], index: 5, kind: input, shape index: {}]   ;;  %s2235_s6 = inlined_call_operand.vmem [shape: f32[1,32], index: 6, kind: input, shape index: {}]   ;;  %s2236_s7 = inlined_call_operand.vmem [shape: bf16[32,32], index: 7, kind: input, shape index: {}]   ;;  %s2237_s8 = inlined_call_operand.vmem [shape: f32[1,32], index: 8, kind: input, shape index: {}]   ;;  %s2238_s9 = inlined_call_operand.hbm [shape: bf16[32,32], index: 9, kind: input, shape index: {}]   ;;  %s2239_s10 = inlined_call_operand.vmem [shape: f32[1,32], index: 10, kind: input, shape index: {}]   ;;  %s2240_s11 = inlined_call_operand.vmem [shape: f32[1,32], index: 11, kind: input, shape index: {}]   ;;  %s2241_s12 = inlined_call_operand.vmem [shape: f32[1,32], index: 12, kind: input, shape index: {}]   ;;  %s2242_s13 = inlined_call_operand.hbm [shape: bf16[32,64], index: 13, kind: input, shape index: {}]   ;;  %s2243_s14 = inlined_call_operand.vmem [shape: f32[1,64], index: 14, kind: input, shape index: {}]   ;;  %s2244_s15 = inlined_call_operand.vmem [shape: bf16[64,32], index: 15, kind: input, shape index: {}]   ;;  %s2245_s16 = inlined_call_operand.vmem [shape: f32[1,32], index: 16, kind: input, shape index: {}]   ;;  %s2246_s17 = inlined_call_operand.hbm [shape: f32[2,8,32], index: 17, kind: output, shape index: {}]  }
   0x1   :  { %2263 = sst [smem:[#allocation23_spill]] %s2229_s0 }
   0x2   :  { %2264 = sst [smem:[#allocation24_spill]] %s2230_s1 }
   0x3   :  { %2265 = sst [smem:[#allocation25_spill]] %s2237_s8 }
   0x4   :  { %2266 = sst [smem:[#allocation26_spill]] %s2238_s9 }
   0x5   :  { %2267 = sst [smem:[#allocation27_spill]] %s2239_s10 }
   0x6   :  { %2268 = sst [smem:[#allocation28_spill]] %s2240_s11 }
   0x7   :  { %2269 = sst [smem:[#allocation29_spill]] %s2241_s12 }
   0x8   :  { %2270 = sst [smem:[#allocation30_spill]] %s2242_s13 }
   0x9   :  { %2271 = sst [smem:[#allocation31_spill]] %s2243_s14 }
   0xa   :  { %2272 = sst [smem:[#allocation32_spill]] %s2244_s15 }
   0xb   :  { %2273 = sst [smem:[#allocation33_spill]] %s2245_s16 }
   0xc   :  { %2274 = sst [smem:[#allocation34_spill]] %s2246_s17 }
   0xd   :  { %22 = vsyncpa [#allocation4], 0 }
   0xe   :  { %24 = vsyncpa [#allocation4 + $0x1], 0 }
   0xf   :  { %25 = vsyncpa [#allocation7], 0 }
  0x10   :  { %27 = vsyncpa [#allocation7 + $0x1], 0 }
  0x11   :  { %28 = vsyncpa [#allocation10], 0 }
  0x12   :  { %29 = vsyncpa [#allocation5], 0 }
  0x13   :  { %31 = vsyncpa [#allocation5 + $0x1], 0  ;;  %s1913_s24 = smov 0   ;;  %s1915_s25 = smov 0  }
  0x14   :  { %s1917_s26 = smov 0   ;;  %s1919_s27 = smov 0  }
  0x15 LB: > { %2275 = sst [smem:[#allocation17_spill]] %s1798_s24  ;;  %s1937_s30 = sadd.s32 4294967295, %s1810_s27   ;;  %s1810_s27 = sphi %s1919_s27, %s2309_s27   ;;  %s1806_s26 = sphi %s1917_s26, %s2313_s26   ;;  %s1802_s25 = sphi %s1915_s25, %s2312_s25   ;;  %s1798_s24 = sphi %s1913_s24, %s2311_s24  }
  0x16   : > { %2276 = sst [smem:[#allocation18_spill]] %s1810_s27  ;;  %p1365_p0 = scmp.ge.s32.totalorder %s1810_s27, 1 }
  0x17   : > { %s2277_s9 = sld [smem:[#allocation26_spill]]  ;;  %p2261_p1 = scmp.eq.s32.totalorder %s1937_s30, 0 }
  0x18   : > { %p440_p2 = scmp.lt.s32.totalorder %s1810_s27, 3  ;;  %s1812_s19 = smov [#allocation9]  }
  0x19   : > { %s471_s1 = sshll.u32 %s1812_s19, 4  ;;  %s2249_s21 = smov 64   ;;  %s472_s1 = int_to_ptr.vmem [resolvable:$true] %s471_s1 }
  0x1a   : > { %p1942_p3 = pnand %p1365_p0, %p440_p2  ;;  %s2250_s22 = smov 4  }
  0x1b   : > { %s1364_s23 = sadd.s32 4294967294, %s1810_s27   ;;  %s1962_s28 = sadd.s32 1, %s1810_s27  }
  0x1c   : > { %p1486_p4 = pneg %p1942_p3  ;;  %2280 = sst [smem:[#allocation19_spill]] %s1962_s28 }
  0x1d   : > { %s469_s0 = sshll.u32 %s2277_s9, 4  ;;  %s44_s29 = sadd.s32 1, %s1806_s26  ;;  %s470_s0 = int_to_ptr.hbm [resolvable:$true] %s469_s0 }
  0x1e   : > { %p1951_p6 = pnand %p1486_p4, %p2261_p1  ;;  %s41_s19 = ssub.s32 %s1810_s27, %s1962_s28 }
  0x1f   : > { %p51_p7 = scmp.ne.s32.totalorder %s1806_s26, %s1802_s25  ;;  %p42_p8 = scmp.eq.s32.totalorder %s41_s19, 0 }
  0x20   : > { %1489 = dma.hbm_to_vmem [thread:$0]  (!%p1951_p6), %s470_s0, 256, %s472_s1, [#allocation10], %s2249_s21, %s2249_s21, %s2250_s22  }
  0x21   : > { %p52_p9 = scmp.eq.s32.totalorder %s1810_s27, 0  ;;  %p57_p10 = scmp.ne.s32.totalorder %s1802_s25, %s1798_s24 }
  0x22   : > { %p427_p11 = scmp.eq.s32.totalorder %s1937_s30, 1  ;;  %p433_p2 = scmp.eq.s32.totalorder %s1364_s23, 1 }
  0x23   : > { %s1974_s9 = scalar_select %p42_p8, %s1806_s26, %s44_s29  }
  0x24   : > { %p53_p12 = por %p52_p9, %p51_p7  ;;  %p1978_p13 = por %p2261_p1, %p57_p10 }
  0x25   : > { %2281 = sst [smem:[#allocation20_spill]] %s1974_s9  ;;  %p1982_p0 = por %p427_p11, %p51_p7 }
  0x26   : > { %p1509_p4 = scmp.lt.s32.totalorder %s1810_s27, 2  ;;  %s2258_s21 = sand.u32 1, %s1806_s26  }
  0x27   : > { %s2283_s1 = scalar_select %p1982_p0, 1, 0 }
  0x28   : > { %p1988_p5 = por %p433_p2, %p57_p10  ;;  %s1994_s29 = sshll.u32 %s2258_s21, 2 }
  0x29   : > { %2284 = sst [smem:[#allocation21_spill]] %s2283_s1  ;;  %s1997_s22 = sshll.u32 %s1810_s27, 2 }
  0x2a   : > { %s2285_s19 = scalar_select %p1988_p5, 1, 0 }
  0x2b   : > { %p1999_p8 = pnand %p1509_p4, %p53_p12  ;;  %s536_s23 = sand.u32 1, %s1810_s27  }
  0x2c   : > { %2286 = sst [smem:[#allocation22_spill]] %s2285_s19  ;;  %s540_s16 = scalar_lea.vmem [#allocation6], %s1994_s29 }
  0x2d   : > { %s2288_s1 = sld [smem:[#allocation24_spill]]  ;;  %s548_s19 = sshll.u32 %s540_s16, 4  ;;  %s549_s19 = int_to_ptr.vmem [resolvable:$true] %s548_s19 }
  0x2e   : > { %s2289_s13 = sld [smem:[#allocation30_spill]]  ;;  %s2012_s15 = scalar_lea.sflag [#allocation7], %s536_s23 }
  0x2f   : > { %p1620_p9 = pneg %p1999_p8 }
  0x33   : > { %s544_s17 = scalar_lea.hbm %s2288_s1, %s1997_s22  ;;  %s1623_s24 = scalar_lea.hbm %s2288_s1, 8 }
  0x34   : > { %s546_s14 = sshll.u32 %s544_s17, 4  ;;  %s492_s11 = sshll.u32 %s2289_s13, 4  ;;  %s547_s14 = int_to_ptr.hbm [resolvable:$true] %s546_s14  ;;  %s493_s11 = int_to_ptr.hbm [resolvable:$true] %s492_s11 }
  0x35   : > { %s1616_s10 = sshra.s32 %s547_s14, 4  ;;  %s1617_s10 = int_to_ptr.hbm [resolvable:$true] %s1616_s10 }
  0x36   : > { %s1618_s8 = scalar_lea.hbm %s1617_s10, 4  ;;  %p1624_p12 = scmp.lt.s32.totalorder %s1617_s10, %s2288_s1 }
  0x37   : > { %p1619_p7 = scmp.ne.s32.totalorder %s1617_s10, %s1618_s8  ;;  %p1625_p2 = scmp.lt.s32.totalorder %s1623_s24, %s1618_s8 }
  0x39   : > { %p1621_p10 = pnand %p1620_p9, %p1619_p7  ;;  %p1626_p4 = por %p1625_p2, %p1624_p12 }
  0x3b   : > { %p1622_p11 = pneg %p1621_p10 }
  0x3d   : > { %p1627_p1 = pnand %p1626_p4, %p1622_p11 }
  0x3f   : > { %1630 = shalt.err (!%p1627_p1)
}
  0x40   : > { %1499 = dma.hbm_to_vmem [thread:$0]  (!%p1999_p8), %s547_s14, 64, %s549_s19, %s2012_s15  }
  0x41   : > { %s1815_s12 = smov [#allocation11]   ;;  %s2290_s27 = smov 4  }
  0x42   : > { %s494_s21 = sshll.u32 %s1815_s12, 4  ;;  %s2291_s10 = smov 64   ;;  %s495_s21 = int_to_ptr.vmem [resolvable:$true] %s494_s21 }
  0x43   : > { %1492 = dma.hbm_to_vmem [thread:$0]  (!%p1951_p6), %s493_s11, 256, %s495_s21, [#allocation10], %s2291_s10, %s2291_s10, %s2290_s27  }
  0x44   : > { %s2292_s16 = sld [smem:[#allocation23_spill]]  ;;  %s521_s24 = scalar_lea.vmem [#allocation3], %s1994_s29 }
  0x45   : > { %s529_s28 = sshll.u32 %s521_s24, 4  ;;  %s2293_s14 = sand.u32 1, %s1806_s26   ;;  %s530_s28 = int_to_ptr.vmem [resolvable:$true] %s529_s28 }
  0x46   : > { %s518_s19 = scalar_lea.sflag [#allocation4], %s2293_s14 }
  0x4a   : > { %s525_s17 = scalar_lea.hbm %s2292_s16, %s1997_s22  ;;  %s1683_s21 = scalar_lea.hbm %s2292_s16, 8 }
  0x4b   : > { %s527_s1 = sshll.u32 %s525_s17, 4  ;;  %s528_s1 = int_to_ptr.hbm [resolvable:$true] %s527_s1 }
  0x4c   : > { %s1676_s13 = sshra.s32 %s528_s1, 4  ;;  %s1677_s13 = int_to_ptr.hbm [resolvable:$true] %s1676_s13 }
  0x4d   : > { %s1678_s12 = scalar_lea.hbm %s1677_s13, 4  ;;  %p1684_p6 = scmp.lt.s32.totalorder %s1677_s13, %s2292_s16 }
  0x4e   : > { %p1679_p1 = scmp.ne.s32.totalorder %s1677_s13, %s1678_s12  ;;  %p1685_p11 = scmp.lt.s32.totalorder %s1683_s21, %s1678_s12 }
  0x50   : > { %p1681_p7 = pnand %p1679_p1, %p1620_p9  ;;  %p1686_p12 = por %p1685_p11, %p1684_p6 }
  0x52   : > { %p1682_p10 = pneg %p1681_p7 }
  0x54   : > { %p1687_p2 = pnand %p1686_p12, %p1682_p10 }
  0x56   : > { %1690 = shalt.err (!%p1687_p2)
}
  0x57   : > { %1496 = dma.hbm_to_vmem [thread:$0]  (!%p1999_p8), %s528_s1, 64, %s530_s28, %s518_s19  }
  0x58   : > { %s563_s17 = scalar_lea.hbm %s2231_s2, %s1997_s22  ;;  %s559_s24 = scalar_lea.vmem [#allocation8], %s1994_s29 }
  0x59   : > { %s567_s14 = sshll.u32 %s559_s24, 4  ;;  %s565_s11 = sshll.u32 %s563_s17, 4  ;;  %s568_s14 = int_to_ptr.vmem [resolvable:$true] %s567_s14  ;;  %s566_s11 = int_to_ptr.hbm [resolvable:$true] %s565_s11 }
  0x5a   : > { %s1706_s13 = sshra.s32 %s566_s11, 4  ;;  %s1713_s1 = scalar_lea.hbm %s2231_s2, 8  ;;  %s1707_s13 = int_to_ptr.hbm [resolvable:$true] %s1706_s13 }
  0x5b   : > { %s1708_s12 = scalar_lea.hbm %s1707_s13, 4  ;;  %p1714_p10 = scmp.lt.s32.totalorder %s1707_s13, %s2231_s2 }
  0x5c   : > { %p1709_p4 = scmp.ne.s32.totalorder %s1707_s13, %s1708_s12  ;;  %p1715_p6 = scmp.lt.s32.totalorder %s1713_s1, %s1708_s12 }
  0x5e   : > { %p1711_p1 = pnand %p1709_p4, %p1620_p9  ;;  %p1716_p11 = por %p1715_p6, %p1714_p10 }
  0x60   : > { %p1712_p7 = pneg %p1711_p1 }
  0x62   : > { %p1717_p12 = pnand %p1716_p11, %p1712_p7 }
  0x64   : > { %1720 = shalt.err (!%p1717_p12)
}
  0x65   : > { %1502 = dma.hbm_to_vmem [thread:$0]  (!%p1999_p8), %s566_s11, 64, %s568_s14, %s2012_s15  }
  0x66   : > { %576 = sbr.rel (%p1942_p3) target bundleno = 1735 (0x6c7), region = 88  ;;  %s2071_s22 = sand.u32 (!%p1942_p3), 1, %s1802_s25  }
  0x67   : > { %s2074_s29 = sshll.u32 (!%p1942_p3), %s2071_s22, 2  ;;  %s579_s27 = scalar_lea.sflag (!%p1942_p3), [#allocation4], %s2071_s22 }
  0x68   : > { %s582_s10 = scalar_lea.vmem (!%p1942_p3), [#allocation3], %s2074_s29 }
  0x6b   : > { %1781 = dma.done.wait (%p1978_p13), %s579_s27, 64  }
  0x6c   : > { %1783 = vsyncadd (%p1978_p13), %s579_s27, 4294967232  ;;  %s588_s9 = sand.u32 1, %s1937_s30   ;;  %s592_s18 = scalar_lea.vmem [#allocation6], %s2074_s29 }
  0x6d   : > { %s589_s15 = scalar_lea.sflag [#allocation7], %s588_s9 }
  0x6e   : > { %1785 = dma.done.wait (%p1978_p13), %s589_s15, 128  }
  0x6f   : > { %1787 = vsyncadd (%p1978_p13), %s589_s15, 4294967168  ;;  %s602_s8 = scalar_lea.vmem [#allocation8], %s2074_s29  ;;  %p2294_p3 = scmp.eq.s32.totalorder %s1937_s30, 0 }
  0x71   : > { %1789 = dma.done.wait (%p2294_p3), [#allocation10], 512   ;;  %p2295_p8 = pmov %p2294_p3 }
  0x72   : > { %v1457_v0 = vld [vmem:[%s2232_s3 + $0x8] sm:$0xff]  ;;  %v1456_v2 = vld [vmem:[%s2232_s3] sm:$0xff]  ;;  %vm697_vm0 = vcmask 261120   ;;  %vm790_vm1 = vcmask 64512   ;;  %s1816_s19 = smov 112   ;;  %s1817_s27 = smov 120  }
  0x73   : > { %1791 = vsyncadd (%p2295_p8), [#allocation10], 4294966784  ;;  %v1459_v1 = vld [vmem:[%s2234_s5 + $0x8] sm:$0xff]  ;;  %707 = vmatpush.bf16.msra.mxu0 %v1457_v0  ;;  %v1458_v3 = vld [vmem:[%s2234_s5] sm:$0xff]  ;;  %s2296_s17 = sld [smem:[#allocation25_spill]]  ;;  %vm825_vm2 = vcmask 1043456  }
  0x74   : > { %745 = vmatpush.bf16.msra.mxu1 %v1459_v1  ;;  %v675_v4 = vld [vmem:[%s582_s10] sm:$0xf]  ;;  %v676_v5 = vld [vmem:[%s592_s18] sm:$0xf]  ;;  %v1556_v6 = vld [vmem:[%s2233_s4] ss:$0 sm:$0xff] }
  0x75   : > { %v1557_v7 = vld [vmem:[%s2235_s6] ss:$0 sm:$0xff]  ;;  %s1818_s10 = smov 104   ;;  %v1461_v22 = vld [vmem:[%s2236_s7 + $0x8] sm:$0xff]  ;;  %v787_v31 = vld [vmem:[%s602_s8] sm:$0xf] }
  0x76   : > { %779 = vmatpush.bf16.msra.mxu2 %v1461_v22  ;;  %v788_v32 = vunpack.c.l.bf16 %v787_v31  ;;  %v1460_v39 = vld [vmem:[%s2236_s7] sm:$0xff]  ;;  %vm843_vm3 = vcmask 60416   ;;  %s1819_s24 = smov 8   ;;  %s1820_s14 = smov 24   ;;  %vm915_vm4 = vcmask 126016   ;;  %vm978_vm5 = vcmask 191616  }
  0x77   : > { %708 = vmatpush.bf16.msra.mxu0 %v1456_v2  ;;  %s1821_s11 = smov 16   ;;  %vm1041_vm6 = vcmask 257216   ;;  %s2297_s12 = sld [smem:[#allocation27_spill]]  ;;  %vm1197_vm10 = vcmask 523264  }
  0x78   : > { %746 = vmatpush.bf16.msra.mxu1 %v1458_v3  ;;  %v789_v33 = vmul.f32 -1e+09, %v788_v32  ;;  %s2298_s1 = sld [smem:[#allocation32_spill]]  ;;  %s1381_s0 = sshll.u32 %s2071_s22, 3 }
  0x79   : > { %v1558_v57 = vld [vmem:[%s2296_s17] ss:$0 sm:$0xff]  ;;  %s2299_s9 = sld [smem:[#allocation28_spill]]  ;;  %s673_s18 = scalar_lea.vmem [#allocation12], %s1381_s0 }
  0x7a   : > { %1390 = vmatmul.msk.bf16.vlgmr.msra.gmra.mxu0 %vm697_vm0, %v675_v4  ;;  %780 = vmatpush.bf16.msra.mxu2 %v1460_v39  ;;  %s2300_s23 = sld [smem:[#allocation29_spill]] }
  0x7b   : > { %1399 = vmatmul.msk.bf16.vlgmr.msra.gmra.mxu1 %vm697_vm0, %v676_v5  ;;  %s2301_s13 = sld [smem:[#allocation31_spill]] }
  0x7c   : > { %s2302_s28 = sld [smem:[#allocation33_spill]] }
  0x7d   : > { %1408 = vmatmul.msk.bf16.vlgmr.msra.gmra.mxu2 %vm697_vm0, %v676_v5 }
  0xf7   : > { %v710_v8 = vpop.f32.mrf.mxu0 }
  0xf8   : > { %v748_v9 = vpop.f32.mrf.mxu1  ;;  %v711_v10 = vadd.f32 %v1556_v6, %v710_v8 }
  0xf9   : > { %v749_v11 = vadd.f32 %v1557_v7, %v748_v9 }
  0xfa   : > { %v714_v12 = vmul.f32 0.35355338, %v711_v10 }
  0xfb   : > { %v752_v13 = vpack.c.bf16 %v749_v11, %v749_v11 }
  0xfc   : > { %v715_v14 = vpack.c.bf16 %v714_v12, %v714_v12 }
  0xfd   : > { %v851_v15 = vunpack.c.l.b16 %v752_v13  ;;  %v795_v16 = vsel %vm790_vm1, %v752_v13, 0 }
  0xfe   : > { %804 = vmatpush.bf16.xpose.msra.mxu3 %v795_v16  ;;  %v846_v17 = vunpack.c.l.b16 %v715_v14 }
  0xff   : > { %v852_v18 = vpack.c.b16 %v851_v15, %v851_v15  ;;  %v712_v19 = vpop.f32.mrf.mxu0 }
 0x100   : > { %v750_v20 = vpop.f32.mrf.mxu1  ;;  %v847_v21 = vpack.c.b16 %v846_v17, %v846_v17  ;;  %v782_v58 = vpop.f32.mrf.mxu2 }
 0x101   : > { %919 = vrot.lane.b32.xlu1 %v852_v18, %s1816_s19  ;;  %853 = vrot.lane.b32.xlu0 %v852_v18, %s1817_s27  ;;  %v783_v59 = vadd.f32 %v1558_v57, %v782_v58 }
 0x102   : > { %917 = vrot.lane.b32.xlu2 %v847_v21, %s1816_s19 }
 0x103   : > { %v786_v60 = vpack.c.bf16 %v783_v59, %v783_v59 }
 0x105   : > { %1409 = vmatmul.msk.bf16.vlgmr.msra.gmra.mxu3 %vm790_vm1, %v715_v14  ;;  %v887_v61 = vunpack.c.l.b16 %v786_v60  ;;  %v827_v62 = vsel %vm825_vm2, %v786_v60, 0 }
 0x106   : > { %836 = vmatpush.bf16.msrb.mxu0 %v827_v62 }
 0x107   : > { %v888_v63 = vpack.c.b16 %v887_v61, %v887_v61  ;;  %v1822_v61 = vmov 32.0  }
 0x108   : > { %v784_v0 = vpop.f32.mrf.mxu2 }
 0x109   : > { %982 = vrot.lane.b32.xlu1 %v852_v18, %s1818_s10  ;;  %848 = vrot.lane.b32.xlu0 %v847_v21, %s1817_s27 }
 0x10a   : > { %980 = vrot.lane.b32.xlu2 %v847_v21, %s1818_s10 }
 0x15c   : > { %v918_v27 = vpop.permute.xlu2 %917 }
 0x164   : > { %v981_v36 = vpop.permute.xlu2 %980 }
 0x173   : > { %v920_v23 = vpop.permute.xlu1 %919  ;;  %v854_v24 = vpop.permute.xlu0 %853 }
 0x174   : > { %v859_v25 = vsel %vm790_vm1, %v854_v24, 0  ;;  %v925_v26 = vsel %vm790_vm1, %v920_v23, 0 }
 0x175   : > { %868 = vmatpush.bf16.xpose.msrb.mxu1 %v859_v25  ;;  %934 = vmatpush.bf16.xpose.msrb.mxu3 %v925_v26 }
 0x17b   : > { %v983_v28 = vpop.permute.xlu1 %982  ;;  %v849_v29 = vpop.permute.xlu0 %848 }
 0x17c   : > { %v988_v30 = vsel %vm790_vm1, %v983_v28, 0  ;;  %1411 = vmatmul.msk.bf16.vlgmr.msrb.gmra.mxu1 %vm790_vm1, %v849_v29  ;;  %1413 = vmatmul.msk.bf16.vlgmr.msrb.gmra.mxu3 %vm790_vm1, %v918_v27 }
 0x17d   : > { %997 = vmatpush.bf16.xpose.msra.mxu1 %v988_v30 }
 0x188   : > { %v806_v34 = vpop.f32.mrf.mxu3 }
 0x189   : > { %v807_v35 = vadd.f32 %v806_v34, %v789_v33 }
 0x18b   : > { %v810_v37 = vsel %vm790_vm1, %v807_v35, -inf }
 0x18c   : > { %1415 = vmatmul.msk.bf16.vlgmr.msra.gmra.mxu1 %vm790_vm1, %v981_v36  ;;  %811 = vmax.xlane.f32.xlu1 %v810_v37 }
 0x190   : > { %v808_v38 = vpop.f32.mrf.mxu3 }
 0x1f9   : > { %v870_v40 = vpop.f32.mrf.mxu1 }
 0x1fa   : > { %v871_v41 = vadd.f32 %v870_v40, %v789_v33 }
 0x1fc   : > { %v874_v42 = vsel %vm790_vm1, %v871_v41, -inf }
 0x1fd   : > { %875 = vmax.xlane.f32.xlu0 %v874_v42 }
 0x1ff   : > { %v936_v43 = vpop.f32.mrf.mxu3  ;;  %v812_v44 = vpop.xlane.xlu1 %811 }
 0x200   : > { %v813_v45 = vsub.f32 %v807_v35, %v812_v44  ;;  %v937_v54 = vadd.f32 %v936_v43, %v789_v33 }
 0x201   : > { %v872_v46 = vpop.f32.mrf.mxu1 }
 0x202   : > { %v814_v47 = vmul.f32 1.442695, %v813_v45  ;;  %v940_v56 = vsel %vm790_vm1, %v937_v54, -inf }
 0x204   : > { %1564 = vpow2.f32 %v814_v47 }
 0x207   : > { %v938_v48 = vpop.f32.mrf.mxu3 }
 0x209   : > { %v999_v49 = vpop.f32.mrf.mxu1 }
 0x20a   : > { %v1565_v50 = vpop.eup %1564  ;;  %v1000_v51 = vadd.f32 %v999_v49, %v789_v33 }
 0x20b   : > { %v816_v52 = vsel %vm790_vm1, %v1565_v50, 0.0 }
 0x20c   : > { %817 = vadd.xlane.f32.xlu1 %v816_v52  ;;  %v1003_v53 = vsel %vm790_vm1, %v1000_v51, -inf  ;;  %v1462_v52 = vld [vmem:[#allocation9] sm:$0xff] }
 0x20d   : > { %1004 = vmax.xlane.f32.xlu2 %v1003_v53 }
 0x211   : > { %v1001_v55 = vpop.f32.mrf.mxu1 }
 0x215   : > { %941 = vmax.xlane.f32.xlu2 %v940_v56  ;;  %v1559_v56 = vld [vmem:[%s2297_s12] ss:$0 sm:$0xff]  ;;  %s1453_s12 = sshll.u32 %s1937_s30, 3  ;;  %s1217_s30 = scalar_lea.sflag [#allocation5], %s2071_s22 }
 0x22d   : > { %889 = vrot.lane.b32.xlu2 %v888_v63, %s1817_s27 }
 0x270   : > { %v876_v1 = vpop.xlane.xlu0 %875 }
 0x271   : > { %v877_v2 = vsub.f32 %v871_v41, %v876_v1 }
 0x273   : > { %v878_v3 = vmul.f32 1.442695, %v877_v2 }
 0x275   : > { %1566 = vpow2.f32 %v878_v3 }
 0x27b   : > { %v1567_v4 = vpop.eup %1566 }
 0x27c   : > { %v880_v5 = vsel %vm790_vm1, %v1567_v4, 0.0 }
 0x27d   : > { %881 = vadd.xlane.f32.xlu0 %v880_v5 }
 0x27f   : > { %v818_v6 = vpop.xlane.xlu1 %817 }
 0x280   : > { %1568 = vrcp.f32 %v818_v6  ;;  %v1005_v7 = vpop.xlane.xlu2 %1004 }
 0x281   : > { %v1006_v8 = vsub.f32 %v1000_v51, %v1005_v7  ;;  %v1463_v51 = vld [vmem:[#allocation9 + $0x8] sm:$0xff] }
 0x282   : > { %1073 = vmatpush.bf16.msra.mxu3 %v1463_v51 }
 0x283   : > { %v1007_v9 = vmul.f32 1.442695, %v1006_v8 }
 0x285   : > { %1570 = vpow2.f32 %v1007_v9  ;;  %v1465_v9 = vld [vmem:[#allocation11 + $0x8] sm:$0xff] }
 0x286   : > { %v1569_v10 = vpop.eup %1568  ;;  %1074 = vmatpush.bf16.msra.mxu3 %v1462_v52 }
 0x287   : > { %v820_v11 = vmul.f32 %v1569_v10, %v1565_v50  ;;  %v1464_v10 = vld [vmem:[#allocation11] sm:$0xff] }
 0x288   : > { %v942_v12 = vpop.xlane.xlu2 %941 }
 0x289   : > { %v943_v13 = vsub.f32 %v937_v54, %v942_v12  ;;  %v821_v14 = vpack.c.bf16 %v820_v11, %v820_v11 }
 0x28b   : > { %v1571_v15 = vpop.eup %1570  ;;  %v944_v16 = vmul.f32 1.442695, %v943_v13  ;;  %1410 = vmatmul.msk.bf16.vlgmr.msrb.gmra.mxu0 %vm790_vm1, %v821_v14  ;;  %v1469_v13 = vld [vmem:[%s2298_s1 + $0x18] sm:$0xff] }
 0x28c   : > { %v1009_v17 = vsel %vm790_vm1, %v1571_v15, 0.0  ;;  %1205 = vmatpush.bf16.msrb.mxu1 %v1469_v13 }
 0x28d   : > { %1572 = vpow2.f32 %v944_v16  ;;  %1010 = vadd.xlane.f32.xlu0 %v1009_v17 }
 0x290   : > { %v890_v20 = vpop.permute.xlu2 %889 }
 0x291   : > { %v895_v21 = vsel %vm825_vm2, %v890_v20, 0 }
 0x292   : > { %904 = vmatpush.bf16.msrb.mxu2 %v895_v21 }
 0x293   : > { %v1573_v18 = vpop.eup %1572 }
 0x294   : > { %v946_v19 = vsel %vm790_vm1, %v1573_v18, 0.0 }
 0x295   : > { %947 = vadd.xlane.f32.xlu1 %v946_v19 }
 0x2a1   : > { %1015 = vrot.lane.b32.xlu0 %v888_v63, %s1818_s10  ;;  %s2303_s10 = sld [smem:[#allocation34_spill]] }
 0x2a7   : > { %s1227_s15 = scalar_lea.hbm %s2303_s10, %s1453_s12 }
 0x2a8   : > { %s1231_s29 = sshll.u32 %s1227_s15, 4  ;;  %s1232_s29 = int_to_ptr.hbm [resolvable:$true] %s1231_s29 }
 0x2a9   : > { %s1750_s8 = sshra.s32 %s1232_s29, 4  ;;  %s1751_s8 = int_to_ptr.hbm [resolvable:$true] %s1750_s8 }
 0x2aa   : > { %s1752_s17 = scalar_lea.hbm %s1751_s8, 8  ;;  %p1757_p4 = scmp.lt.s32.totalorder %s1751_s8, %s2303_s10 }
 0x2ab   : > { %p1753_p13 = scmp.ne.s32.totalorder %s1751_s8, %s1752_s17 }
 0x2ad   : > { %p1754_p9 = pnand %p1753_p13, %p1982_p0 }
 0x2ae   : > { %952 = vrot.lane.b32.xlu1 %v888_v63, %s1816_s19 }
 0x2af   : > { %p1755_p2 = pneg %p1754_p9 }
 0x2f0   : > { %v882_v22 = vpop.xlane.xlu0 %881 }
 0x2f1   : > { %1574 = vrcp.f32 %v882_v22 }
 0x2f7   : > { %v1575_v23 = vpop.eup %1574 }
 0x2f8   : > { %v884_v24 = vmul.f32 %v1575_v23, %v1567_v4 }
 0x2fa   : > { %v885_v25 = vpack.c.bf16 %v884_v24, %v884_v24 }
 0x2fc   : > { %1412 = vmatmul.msk.bf16.vlgmr.msrb.gmra.mxu2 %vm790_vm1, %v885_v25 }
 0x300   : > { %v1011_v26 = vpop.xlane.xlu0 %1010 }
 0x301   : > { %1576 = vrcp.f32 %v1011_v26  ;;  %v1560_v26 = vld [vmem:[%s2299_s9] ss:$0 sm:$0xff] }
 0x307   : > { %v1577_v29 = vpop.eup %1576 }
 0x308   : > { %v838_v27 = vpop.f32.mrf.mxu0  ;;  %v1013_v31 = vmul.f32 %v1577_v29, %v1571_v15  ;;  %v948_v32 = vpop.xlane.xlu1 %947  ;;  %v1468_v15 = vld [vmem:[%s2298_s1 + $0x10] sm:$0xff] }
 0x309   : > { %v842_v28 = vpack.c.bf16 %v838_v27, %v838_v27  ;;  %1578 = vrcp.f32 %v948_v32  ;;  %1206 = vmatpush.bf16.msrb.mxu1 %v1468_v15 }
 0x30a   : > { %v1014_v35 = vpack.c.bf16 %v1013_v31, %v1013_v31  ;;  %1580 = vrcp.f32 %v1822_v61 }
 0x30b   : > { %844 = vst.msk [vmem:[#allocation2] sm:$0xf] %vm843_vm3, %v842_v28  ;;  %v1561_v28 = vld [vmem:[%s2300_s23] ss:$0 sm:$0xff]  ;;  %s1229_s23 = sshll.u32 %s673_s18, 4  ;;  %s1230_s23 = int_to_ptr.vmem [resolvable:$true] %s1229_s23 }
 0x30f   : > { %v1579_v36 = vpop.eup %1578 }
 0x310   : > { %v840_v30 = vpop.f32.mrf.mxu0  ;;  %v950_v37 = vmul.f32 %v1579_v36, %v1573_v18  ;;  %v1581_v62 = vpop.eup %1580 }
 0x311   : > { %v1084_v63 = vmul.f32 32.0, %v1581_v62  ;;  %vm1088_vm7 = vweird.f32 %v1581_v62 }
 0x312   : > { %v951_v40 = vpack.c.bf16 %v950_v37, %v950_v37 }
 0x313   : > { %v1016_v33 = vpop.permute.xlu0 %1015  ;;  %v1085_v0 = vsub.f32 1.0, %v1084_v63 }
 0x314   : > { %v1021_v34 = vsel %vm825_vm2, %v1016_v33, 0  ;;  %v1467_v33 = vld [vmem:[%s2298_s1 + $0x8] sm:$0xff] }
 0x315   : > { %1030 = vmatpush.bf16.msra.mxu2 %v1021_v34  ;;  %v1086_v1 = vmul.f32 %v1581_v62, %v1085_v0  ;;  %1207 = vmatpush.bf16.msrb.mxu1 %v1467_v33  ;;  %v1466_v34 = vld [vmem:[%s2298_s1] sm:$0xff] }
 0x317   : > { %v1087_v2 = vadd.f32 %v1581_v62, %v1086_v1 }
 0x318   : > { %1416 = vmatmul.msk.bf16.vlgmr.msra.gmra.mxu2 %vm790_vm1, %v1014_v35  ;;  %v1562_v35 = vld [vmem:[%s2301_s13] ss:$0 sm:$0xff] }
 0x319   : > { %v1089_v3 = vsel %vm1088_vm7, %v1581_v62, %v1087_v2  ;;  %1208 = vmatpush.bf16.msrb.mxu1 %v1466_v34 }
 0x320   : > { %v953_v38 = vpop.permute.xlu1 %952 }
 0x321   : > { %v958_v39 = vsel %vm825_vm2, %v953_v38, 0 }
 0x322   : > { %967 = vmatpush.bf16.msra.mxu0 %v958_v39 }
 0x325   : > { %1414 = vmatmul.msk.bf16.vlgmr.msra.gmra.mxu0 %vm790_vm1, %v951_v40 }
 0x326   : > { %1152 = vmatpush.bf16.msrb.mxu0 %v1465_v9 }
 0x32a   : > { %1153 = vmatpush.bf16.msrb.mxu0 %v1464_v10 }
 0x37f   : > { %v906_v41 = vpop.f32.mrf.mxu2 }
 0x380   : > { %v910_v42 = vpack.c.bf16 %v906_v41, %v906_v41  ;;  %v1563_v41 = vld [vmem:[%s2302_s28] ss:$0 sm:$0xff] }
 0x382   : > { %912 = vrot.lane.b32.xlu2 %v910_v42, %s1819_s24 }
 0x387   : > { %v908_v43 = vpop.f32.mrf.mxu2 }
 0x39b   : > { %v1032_v44 = vpop.f32.mrf.mxu2 }
 0x39c   : > { %v1036_v45 = vpack.c.bf16 %v1032_v44, %v1032_v44 }
 0x39e   : > { %1038 = vrot.lane.b32.xlu2 %v1036_v45, %s1820_s14 }
 0x3a2   : > { %v969_v46 = vpop.f32.mrf.mxu0 }
 0x3a3   : > { %v973_v47 = vpack.c.bf16 %v969_v46, %v969_v46  ;;  %v1034_v48 = vpop.f32.mrf.mxu2 }
 0x3a5   : > { %975 = vrot.lane.b32.xlu0 %v973_v47, %s1821_s11  ;;  %s1756_s11 = scalar_lea.hbm %s2303_s10, 16 }
 0x3a6   : > { %p1758_p1 = scmp.lt.s32.totalorder %s1756_s11, %s1752_s17 }
 0x3a8   : > { %p1759_p7 = por %p1758_p1, %p1757_p4 }
 0x3aa   : > { %v971_v49 = vpop.f32.mrf.mxu0  ;;  %p1760_p10 = pnand %p1759_p7, %p1755_p2 }
 0x3dc   : > { %v913_v50 = vpop.permute.xlu2 %912 }
 0x3dd   : > { %916 = vst.msk [vmem:[#allocation2] sm:$0xf] %vm915_vm4, %v913_v50 }
 0x3f8   : > { %v1039_v54 = vpop.permute.xlu2 %1038 }
 0x417   : > { %v976_v53 = vpop.permute.xlu0 %975 }
 0x418   : > { %979 = vst.msk [vmem:[#allocation2] sm:$0xf] %vm978_vm5, %v976_v53 }
 0x419   : > { %1042 = vst.msk [vmem:[#allocation2] sm:$0xf] %vm1041_vm6, %v1039_v54 }
 0x420   : > { %v1043_v55 = vld [vmem:[#allocation2] sm:$0xf] }
 0x421   : > { %1425 = vmatmul.msk.bf16.vlgmr.msra.gmra.mxu3 %vm697_vm0, %v1043_v55 }
 0x4a4   : > { %v1076_v57 = vpop.f32.mrf.mxu3 }
 0x4a5   : > { %v2162_v58 = vadd.f32 %v1559_v56, %v1076_v57 }
 0x4a7   : > { %v1080_v59 = vsel %vm697_vm0, %v2162_v58, 0.0 }
 0x4a8   : > { %1081 = vadd.xlane.f32.xlu1 %v1080_v59 }
 0x4ac   : > { %v1078_v60 = vpop.f32.mrf.mxu3 }
 0x51b   : > { %v1082_v4 = vpop.xlane.xlu1 %1081 }
 0x51c   : > { %v1090_v5 = vmul.f32 %v1089_v3, %v1082_v4 }
 0x51e   : > { %v1091_v6 = vsub.f32 %v2162_v58, %v1090_v5 }
 0x520   : > { %v1092_v7 = vmul.f32 %v1091_v6, %v1091_v6  ;;  %v1115_v27 = vmul.f32 %v1560_v26, %v1091_v6 }
 0x522   : > { %v1093_v8 = vsel %vm697_vm0, %v1092_v7, 0.0 }
 0x523   : > { %1094 = vadd.xlane.f32.xlu0 %v1093_v8 }
 0x596   : > { %v1095_v11 = vpop.xlane.xlu0 %1094 }
 0x597   : > { %v1096_v12 = vmul.f32 0.032258064, %v1095_v11 }
 0x599   : > { %1582 = vrsqrt.f32 %v1096_v12  ;;  %vm1104_vm8 = vcmp.eq.f32.partialorder %v1096_v12, inf  ;;  %v1107_v22 = vand.u32 2147483648, %v1096_v12  ;;  %vm1106_vm9 = vcmp.eq.f32.partialorder %v1096_v12, 0.0 }
 0x59f   : > { %v1583_v14 = vpop.eup %1582 }
 0x5a0   : > { %v1098_v16 = vmul.f32 %v1583_v14, %v1096_v12 }
 0x5a2   : > { %v1099_v17 = vmul.f32 %v1583_v14, %v1098_v16 }
 0x5a4   : > { %v1100_v18 = vmul.f32 0.5, %v1099_v17 }
 0x5a6   : > { %v1101_v19 = vsub.f32 1.5, %v1100_v18 }
 0x5a8   : > { %v1102_v20 = vmul.f32 %v1583_v14, %v1101_v19 }
 0x5aa   : > { %v1103_v21 = vmul.f32 %v1102_v20, %v1096_v12 }
 0x5ac   : > { %v1105_v23 = vsel %vm1104_vm8, %v1096_v12, %v1103_v21 }
 0x5ad   : > { %v1108_v24 = vsel %vm1106_vm9, %v1107_v22, %v1105_v23 }
 0x5ae   : > { %v1109_v25 = vadd.f32 1e-06, %v1108_v24 }
 0x5b0   : > { %1584 = vrcp.f32 %v1109_v25 }
 0x5b6   : > { %v1585_v29 = vpop.eup %1584 }
 0x5b7   : > { %v1116_v30 = vmul.f32 %v1585_v29, %v1115_v27 }
 0x5b9   : > { %v1121_v31 = vadd.f32 %v1561_v28, %v1116_v30 }
 0x5bb   : > { %v1122_v32 = vpack.c.bf16 %v1121_v31, %v1121_v31 }
 0x5bd   : > { %1434 = vmatmul.msk.bf16.vlgmr.msrb.gmra.mxu0 %vm697_vm0, %v1122_v32 }
 0x63a   : > { %v1155_v36 = vpop.f32.mrf.mxu0 }
 0x63b   : > { %v1156_v37 = vadd.f32 %v1562_v35, %v1155_v36 }
 0x63d   : > { %v1159_v38 = vmax.f32 %v1156_v37, 0.0 }
 0x63f   : > { %v1160_v39 = vpack.c.bf16 %v1159_v38, %v1159_v38 }
 0x641   : > { %1451 = vmatmul.msk.bf16.vlgmr.msrb.gmra.mxu1 %vm1197_vm10, %v1160_v39 }
 0x642   : > { %v1157_v40 = vpop.f32.mrf.mxu0 }
 0x6be   : > { %v1210_v42 = vpop.f32.mrf.mxu1 }
 0x6bf   : > { %v1211_v43 = vadd.f32 %v1563_v41, %v1210_v42 }
 0x6c1   : > { %v1214_v44 = vadd.f32 %v1211_v43, %v2162_v58 }
 0x6c3   : > { %1215 = vst.msk [vmem:[%s673_s18] sm:$0xff] %vm697_vm0, %v1214_v44 }
 0x6c4   : > { %1763 = shalt.err (!%p1760_p10)
}
 0x6c5   : > { %1484 = dma.vmem_to_hbm [thread:$0]  (%p1982_p0), %s1230_s23, 128, %s1232_s29, %s1217_s30  }
 0x6c6   : > { %v1212_v45 = vpop.f32.mrf.mxu1 }
 0x6c7 PF: > { %s2305_s22 = sld [smem:[#allocation17_spill]] }
 0x6c8   : > { %s2307_s20 = sld [smem:[#allocation18_spill]] }
 0x6cd   : > { %s1243_s21 = sand.u32 1, %s2305_s22  }
 0x6ce   : > { %p2308_p6 = scmp.ge.s32.totalorder %s2307_s20, 2  ;;  %s1244_s28 = scalar_lea.sflag [#allocation5], %s1243_s21 }
 0x6d0   : > { %p1504_p11 = pnand %p2308_p6, %p1988_p5 }
 0x6d2   : > { %p1505_p12 = pneg %p1504_p11 }
 0x6d4   : > { %1793 = dma.done.wait (%p1505_p12), %s1244_s28, 128  }
 0x6d5   : > { %1795 = vsyncadd (%p1505_p12), %s1244_s28, 4294967168  ;;  %s2309_s27 = sld [smem:[#allocation19_spill]]  ;;  %s2311_s24 = smov %s1802_s25 }
 0x6d6   : > { %s2310_s19 = sld [smem:[#allocation20_spill]]  ;;  %s2312_s25 = smov %s1806_s26 }
 0x6db   : > { %p34_p3 = scmp.ge.s32.totalorder %s2309_s27, 4  }
 0x6dc   : > { %s2313_s26 = smov %s2310_s19 }
 0x6dd   :  { %36 = sbr.rel (!%p34_p3) target bundleno = 21 (0x15), region = 165 }
 0x6e2   :  { %1250 = vsyncpa [#allocation4], 1 }
 0x6e3   :  { %1252 = vsyncpa [#allocation4 + $0x1], 1 }
 0x6e4   :  { %1253 = vsyncpa [#allocation7], 1 }
 0x6e5   :  { %1255 = vsyncpa [#allocation7 + $0x1], 1 }
 0x6e6   :  { %1256 = vsyncpa [#allocation10], 1 }
 0x6e7   :  { %1257 = vsyncpa [#allocation5], 1 }
 0x6e8   :  { %1259 = vsyncpa [#allocation5 + $0x1], 1 }

// kernel: tpu_custom_call.1
= control target key start
LH: loop header
LB: loop body
LE: loop exit
PB: predicated region body
PF: predicated region fallthrough
CT: control target
= control target key end

     0   :  { %s2229_s0 = inlined_call_operand.hbm [shape: bf16[2,8,32], index: 0, kind: input, shape index: {}]   ;;  %s2230_s1 = inlined_call_operand.hbm [shape: bf16[2,8,32], index: 1, kind: input, shape index: {}]   ;;  %s2231_s2 = inlined_call_operand.hbm [shape: bf16[2,8,8], index: 2, kind: input, shape index: {}]   ;;  %s2232_s3 = inlined_call_operand.vmem [shape: bf16[32,32], index: 3, kind: input, shape index: {}]   ;;  %s2233_s4 = inlined_call_operand.vmem [shape: f32[1,32], index: 4, kind: input, shape index: {}]   ;;  %s2234_s5 = inlined_call_operand.vmem [shape: bf16[32,32], index: 5, kind: input, shape index: {}]   ;;  %s2235_s6 = inlined_call_operand.vmem [shape: f32[1,32], index: 6, kind: input, shape index: {}]   ;;  %s2236_s7 = inlined_call_operand.vmem [shape: bf16[32,32], index: 7, kind: input, shape index: {}]   ;;  %s2237_s8 = inlined_call_operand.vmem [shape: f32[1,32], index: 8, kind: input, shape index: {}]   ;;  %s2238_s9 = inlined_call_operand.hbm [shape: bf16[32,32], index: 9, kind: input, shape index: {}]   ;;  %s2239_s10 = inlined_call_operand.vmem [shape: f32[1,32], index: 10, kind: input, shape index: {}]   ;;  %s2240_s11 = inlined_call_operand.vmem [shape: f32[1,32], index: 11, kind: input, shape index: {}]   ;;  %s2241_s12 = inlined_call_operand.vmem [shape: f32[1,32], index: 12, kind: input, shape index: {}]   ;;  %s2242_s13 = inlined_call_operand.hbm [shape: bf16[32,64], index: 13, kind: input, shape index: {}]   ;;  %s2243_s14 = inlined_call_operand.vmem [shape: f32[1,64], index: 14, kind: input, shape index: {}]   ;;  %s2244_s15 = inlined_call_operand.vmem [shape: bf16[64,32], index: 15, kind: input, shape index: {}]   ;;  %s2245_s16 = inlined_call_operand.vmem [shape: f32[1,32], index: 16, kind: input, shape index: {}]   ;;  %s2246_s17 = inlined_call_operand.hbm [shape: f32[2,8,32], index: 17, kind: output, shape index: {}]  }
   0x1   :  { %2263 = sst [smem:[#allocation23_spill]] %s2229_s0 }
   0x2   :  { %2264 = sst [smem:[#allocation24_spill]] %s2230_s1 }
   0x3   :  { %2265 = sst [smem:[#allocation25_spill]] %s2237_s8 }
   0x4   :  { %2266 = sst [smem:[#allocation26_spill]] %s2238_s9 }
   0x5   :  { %2267 = sst [smem:[#allocation27_spill]] %s2239_s10 }
   0x6   :  { %2268 = sst [smem:[#allocation28_spill]] %s2240_s11 }
   0x7   :  { %2269 = sst [smem:[#allocation29_spill]] %s2241_s12 }
   0x8   :  { %2270 = sst [smem:[#allocation30_spill]] %s2242_s13 }
   0x9   :  { %2271 = sst [smem:[#allocation31_spill]] %s2243_s14 }
   0xa   :  { %2272 = sst [smem:[#allocation32_spill]] %s2244_s15 }
   0xb   :  { %2273 = sst [smem:[#allocation33_spill]] %s2245_s16 }
   0xc   :  { %2274 = sst [smem:[#allocation34_spill]] %s2246_s17 }
   0xd   :  { %22 = vsyncpa [#allocation4], 0 }
   0xe   :  { %24 = vsyncpa [#allocation4 + $0x1], 0 }
   0xf   :  { %25 = vsyncpa [#allocation7], 0 }
  0x10   :  { %27 = vsyncpa [#allocation7 + $0x1], 0 }
  0x11   :  { %28 = vsyncpa [#allocation10], 0 }
  0x12   :  { %29 = vsyncpa [#allocation5], 0 }
  0x13   :  { %31 = vsyncpa [#allocation5 + $0x1], 0  ;;  %s1913_s24 = smov 0   ;;  %s1915_s25 = smov 0  }
  0x14   :  { %s1917_s26 = smov 0   ;;  %s1919_s27 = smov 0  }
  0x15 LB: > { %2275 = sst [smem:[#allocation17_spill]] %s1798_s24  ;;  %s1937_s30 = sadd.s32 4294967295, %s1810_s27   ;;  %s1810_s27 = sphi %s1919_s27, %s2309_s27   ;;  %s1806_s26 = sphi %s1917_s26, %s2313_s26   ;;  %s1802_s25 = sphi %s1915_s25, %s2312_s25   ;;  %s1798_s24 = sphi %s1913_s24, %s2311_s24  }
  0x16   : > { %2276 = sst [smem:[#allocation18_spill]] %s1810_s27  ;;  %p1365_p0 = scmp.ge.s32.totalorder %s1810_s27, 1 }
  0x17   : > { %s2277_s9 = sld [smem:[#allocation26_spill]]  ;;  %p2261_p1 = scmp.eq.s32.totalorder %s1937_s30, 0 }
  0x18   : > { %p440_p2 = scmp.lt.s32.totalorder %s1810_s27, 3  ;;  %s1812_s19 = smov [#allocation9]  }
  0x19   : > { %s471_s1 = sshll.u32 %s1812_s19, 4  ;;  %s2249_s21 = smov 64   ;;  %s472_s1 = int_to_ptr.vmem [resolvable:$true] %s471_s1 }
  0x1a   : > { %p1942_p3 = pnand %p1365_p0, %p440_p2  ;;  %s2250_s22 = smov 4  }
  0x1b   : > { %s1364_s23 = sadd.s32 4294967294, %s1810_s27   ;;  %s1962_s28 = sadd.s32 1, %s1810_s27  }
  0x1c   : > { %p1486_p4 = pneg %p1942_p3  ;;  %2280 = sst [smem:[#allocation19_spill]] %s1962_s28 }
  0x1d   : > { %s469_s0 = sshll.u32 %s2277_s9, 4  ;;  %s44_s29 = sadd.s32 1, %s1806_s26  ;;  %s470_s0 = int_to_ptr.hbm [resolvable:$true] %s469_s0 }
  0x1e   : > { %p1951_p6 = pnand %p1486_p4, %p2261_p1  ;;  %s41_s19 = ssub.s32 %s1810_s27, %s1962_s28 }
  0x1f   : > { %p51_p7 = scmp.ne.s32.totalorder %s1806_s26, %s1802_s25  ;;  %p42_p8 = scmp.eq.s32.totalorder %s41_s19, 0 }
  0x20   : > { %1489 = dma.hbm_to_vmem [thread:$0]  (!%p1951_p6), %s470_s0, 256, %s472_s1, [#allocation10], %s2249_s21, %s2249_s21, %s2250_s22  }
  0x21   : > { %p52_p9 = scmp.eq.s32.totalorder %s1810_s27, 0  ;;  %p57_p10 = scmp.ne.s32.totalorder %s1802_s25, %s1798_s24 }
  0x22   : > { %p427_p11 = scmp.eq.s32.totalorder %s1937_s30, 1  ;;  %p433_p2 = scmp.eq.s32.totalorder %s1364_s23, 1 }
  0x23   : > { %s1974_s9 = scalar_select %p42_p8, %s1806_s26, %s44_s29  }
  0x24   : > { %p53_p12 = por %p52_p9, %p51_p7  ;;  %p1978_p13 = por %p2261_p1, %p57_p10 }
  0x25   : > { %2281 = sst [smem:[#allocation20_spill]] %s1974_s9  ;;  %p1982_p0 = por %p427_p11, %p51_p7 }
  0x26   : > { %p1509_p4 = scmp.lt.s32.totalorder %s1810_s27, 2  ;;  %s2258_s21 = sand.u32 1, %s1806_s26  }
  0x27   : > { %s2283_s1 = scalar_select %p1982_p0, 1, 0 }
  0x28   : > { %p1988_p5 = por %p433_p2, %p57_p10  ;;  %s1994_s29 = sshll.u32 %s2258_s21, 2 }
  0x29   : > { %2284 = sst [smem:[#allocation21_spill]] %s2283_s1  ;;  %s1997_s22 = sshll.u32 %s1810_s27, 2 }
  0x2a   : > { %s2285_s19 = scalar_select %p1988_p5, 1, 0 }
  0x2b   : > { %p1999_p8 = pnand %p1509_p4, %p53_p12  ;;  %s536_s23 = sand.u32 1, %s1810_s27  }
  0x2c   : > { %2286 = sst [smem:[#allocation22_spill]] %s2285_s19  ;;  %s540_s16 = scalar_lea.vmem [#allocation6], %s1994_s29 }
  0x2d   : > { %s2288_s1 = sld [smem:[#allocation24_spill]]  ;;  %s548_s19 = sshll.u32 %s540_s16, 4  ;;  %s549_s19 = int_to_ptr.vmem [resolvable:$true] %s548_s19 }
  0x2e   : > { %s2289_s13 = sld [smem:[#allocation30_spill]]  ;;  %s2012_s15 = scalar_lea.sflag [#allocation7], %s536_s23 }
  0x2f   : > { %p1620_p9 = pneg %p1999_p8 }
  0x33   : > { %s544_s17 = scalar_lea.hbm %s2288_s1, %s1997_s22  ;;  %s1623_s24 = scalar_lea.hbm %s2288_s1, 8 }
  0x34   : > { %s546_s14 = sshll.u32 %s544_s17, 4  ;;  %s492_s11 = sshll.u32 %s2289_s13, 4  ;;  %s547_s14 = int_to_ptr.hbm [resolvable:$true] %s546_s14  ;;  %s493_s11 = int_to_ptr.hbm [resolvable:$true] %s492_s11 }
  0x35   : > { %s1616_s10 = sshra.s32 %s547_s14, 4  ;;  %s1617_s10 = int_to_ptr.hbm [resolvable:$true] %s1616_s10 }
  0x36   : > { %s1618_s8 = scalar_lea.hbm %s1617_s10, 4  ;;  %p1624_p12 = scmp.lt.s32.totalorder %s1617_s10, %s2288_s1 }
  0x37   : > { %p1619_p7 = scmp.ne.s32.totalorder %s1617_s10, %s1618_s8  ;;  %p1625_p2 = scmp.lt.s32.totalorder %s1623_s24, %s1618_s8 }
  0x39   : > { %p1621_p10 = pnand %p1620_p9, %p1619_p7  ;;  %p1626_p4 = por %p1625_p2, %p1624_p12 }
  0x3b   : > { %p1622_p11 = pneg %p1621_p10 }
  0x3d   : > { %p1627_p1 = pnand %p1626_p4, %p1622_p11 }
  0x3f   : > { %1630 = shalt.err (!%p1627_p1)
}
  0x40   : > { %1499 = dma.hbm_to_vmem [thread:$0]  (!%p1999_p8), %s547_s14, 64, %s549_s19, %s2012_s15  }
  0x41   : > { %s1815_s12 = smov [#allocation11]   ;;  %s2290_s27 = smov 4  }
  0x42   : > { %s494_s21 = sshll.u32 %s1815_s12, 4  ;;  %s2291_s10 = smov 64   ;;  %s495_s21 = int_to_ptr.vmem [resolvable:$true] %s494_s21 }
  0x43   : > { %1492 = dma.hbm_to_vmem [thread:$0]  (!%p1951_p6), %s493_s11, 256, %s495_s21, [#allocation10], %s2291_s10, %s2291_s10, %s2290_s27  }
  0x44   : > { %s2292_s16 = sld [smem:[#allocation23_spill]]  ;;  %s521_s24 = scalar_lea.vmem [#allocation3], %s1994_s29 }
  0x45   : > { %s529_s28 = sshll.u32 %s521_s24, 4  ;;  %s2293_s14 = sand.u32 1, %s1806_s26   ;;  %s530_s28 = int_to_ptr.vmem [resolvable:$true] %s529_s28 }
  0x46   : > { %s518_s19 = scalar_lea.sflag [#allocation4], %s2293_s14 }
  0x4a   : > { %s525_s17 = scalar_lea.hbm %s2292_s16, %s1997_s22  ;;  %s1683_s21 = scalar_lea.hbm %s2292_s16, 8 }
  0x4b   : > { %s527_s1 = sshll.u32 %s525_s17, 4  ;;  %s528_s1 = int_to_ptr.hbm [resolvable:$true] %s527_s1 }
  0x4c   : > { %s1676_s13 = sshra.s32 %s528_s1, 4  ;;  %s1677_s13 = int_to_ptr.hbm [resolvable:$true] %s1676_s13 }
  0x4d   : > { %s1678_s12 = scalar_lea.hbm %s1677_s13, 4  ;;  %p1684_p6 = scmp.lt.s32.totalorder %s1677_s13, %s2292_s16 }
  0x4e   : > { %p1679_p1 = scmp.ne.s32.totalorder %s1677_s13, %s1678_s12  ;;  %p1685_p11 = scmp.lt.s32.totalorder %s1683_s21, %s1678_s12 }
  0x50   : > { %p1681_p7 = pnand %p1679_p1, %p1620_p9  ;;  %p1686_p12 = por %p1685_p11, %p1684_p6 }
  0x52   : > { %p1682_p10 = pneg %p1681_p7 }
  0x54   : > { %p1687_p2 = pnand %p1686_p12, %p1682_p10 }
  0x56   : > { %1690 = shalt.err (!%p1687_p2)
}
  0x57   : > { %1496 = dma.hbm_to_vmem [thread:$0]  (!%p1999_p8), %s528_s1, 64, %s530_s28, %s518_s19  }
  0x58   : > { %s563_s17 = scalar_lea.hbm %s2231_s2, %s1997_s22  ;;  %s559_s24 = scalar_lea.vmem [#allocation8], %s1994_s29 }
  0x59   : > { %s567_s14 = sshll.u32 %s559_s24, 4  ;;  %s565_s11 = sshll.u32 %s563_s17, 4  ;;  %s568_s14 = int_to_ptr.vmem [resolvable:$true] %s567_s14  ;;  %s566_s11 = int_to_ptr.hbm [resolvable:$true] %s565_s11 }
  0x5a   : > { %s1706_s13 = sshra.s32 %s566_s11, 4  ;;  %s1713_s1 = scalar_lea.hbm %s2231_s2, 8  ;;  %s1707_s13 = int_to_ptr.hbm [resolvable:$true] %s1706_s13 }
  0x5b   : > { %s1708_s12 = scalar_lea.hbm %s1707_s13, 4  ;;  %p1714_p10 = scmp.lt.s32.totalorder %s1707_s13, %s2231_s2 }
  0x5c   : > { %p1709_p4 = scmp.ne.s32.totalorder %s1707_s13, %s1708_s12  ;;  %p1715_p6 = scmp.lt.s32.totalorder %s1713_s1, %s1708_s12 }
  0x5e   : > { %p1711_p1 = pnand %p1709_p4, %p1620_p9  ;;  %p1716_p11 = por %p1715_p6, %p1714_p10 }
  0x60   : > { %p1712_p7 = pneg %p1711_p1 }
  0x62   : > { %p1717_p12 = pnand %p1716_p11, %p1712_p7 }
  0x64   : > { %1720 = shalt.err (!%p1717_p12)
}
  0x65   : > { %1502 = dma.hbm_to_vmem [thread:$0]  (!%p1999_p8), %s566_s11, 64, %s568_s14, %s2012_s15  }
  0x66   : > { %576 = sbr.rel (%p1942_p3) target bundleno = 1735 (0x6c7), region = 88  ;;  %s2071_s22 = sand.u32 (!%p1942_p3), 1, %s1802_s25  }
  0x67   : > { %s2074_s29 = sshll.u32 (!%p1942_p3), %s2071_s22, 2  ;;  %s579_s27 = scalar_lea.sflag (!%p1942_p3), [#allocation4], %s2071_s22 }
  0x68   : > { %s582_s10 = scalar_lea.vmem (!%p1942_p3), [#allocation3], %s2074_s29 }
  0x6b   : > { %1781 = dma.done.wait (%p1978_p13), %s579_s27, 64  }
  0x6c   : > { %1783 = vsyncadd (%p1978_p13), %s579_s27, 4294967232  ;;  %s588_s9 = sand.u32 1, %s1937_s30   ;;  %s592_s18 = scalar_lea.vmem [#allocation6], %s2074_s29 }
  0x6d   : > { %s589_s15 = scalar_lea.sflag [#allocation7], %s588_s9 }
  0x6e   : > { %1785 = dma.done.wait (%p1978_p13), %s589_s15, 128  }
  0x6f   : > { %1787 = vsyncadd (%p1978_p13), %s589_s15, 4294967168  ;;  %s602_s8 = scalar_lea.vmem [#allocation8], %s2074_s29  ;;  %p2294_p3 = scmp.eq.s32.totalorder %s1937_s30, 0 }
  0x71   : > { %1789 = dma.done.wait (%p2294_p3), [#allocation10], 512   ;;  %p2295_p8 = pmov %p2294_p3 }
  0x72   : > { %v1457_v0 = vld [vmem:[%s2232_s3 + $0x8] sm:$0xff]  ;;  %v1456_v2 = vld [vmem:[%s2232_s3] sm:$0xff]  ;;  %vm697_vm0 = vcmask 261120   ;;  %vm790_vm1 = vcmask 64512   ;;  %s1816_s19 = smov 112   ;;  %s1817_s27 = smov 120  }
  0x73   : > { %1791 = vsyncadd (%p2295_p8), [#allocation10], 4294966784  ;;  %v1459_v1 = vld [vmem:[%s2234_s5 + $0x8] sm:$0xff]  ;;  %707 = vmatpush.bf16.msra.mxu0 %v1457_v0  ;;  %v1458_v3 = vld [vmem:[%s2234_s5] sm:$0xff]  ;;  %s2296_s17 = sld [smem:[#allocation25_spill]]  ;;  %vm825_vm2 = vcmask 1043456  }
  0x74   : > { %745 = vmatpush.bf16.msra.mxu1 %v1459_v1  ;;  %v675_v4 = vld [vmem:[%s582_s10] sm:$0xf]  ;;  %v676_v5 = vld [vmem:[%s592_s18] sm:$0xf]  ;;  %v1556_v6 = vld [vmem:[%s2233_s4] ss:$0 sm:$0xff] }
  0x75   : > { %v1557_v7 = vld [vmem:[%s2235_s6] ss:$0 sm:$0xff]  ;;  %s1818_s10 = smov 104   ;;  %v1461_v22 = vld [vmem:[%s2236_s7 + $0x8] sm:$0xff]  ;;  %v787_v31 = vld [vmem:[%s602_s8] sm:$0xf] }
  0x76   : > { %779 = vmatpush.bf16.msra.mxu2 %v1461_v22  ;;  %v788_v32 = vunpack.c.l.bf16 %v787_v31  ;;  %v1460_v39 = vld [vmem:[%s2236_s7] sm:$0xff]  ;;  %vm843_vm3 = vcmask 60416   ;;  %s1819_s24 = smov 8   ;;  %s1820_s14 = smov 24   ;;  %vm915_vm4 = vcmask 126016   ;;  %vm978_vm5 = vcmask 191616  }
  0x77   : > { %708 = vmatpush.bf16.msra.mxu0 %v1456_v2  ;;  %s1821_s11 = smov 16   ;;  %vm1041_vm6 = vcmask 257216   ;;  %s2297_s12 = sld [smem:[#allocation27_spill]]  ;;  %vm1197_vm10 = vcmask 523264  }
  0x78   : > { %746 = vmatpush.bf16.msra.mxu1 %v1458_v3  ;;  %v789_v33 = vmul.f32 -1e+09, %v788_v32  ;;  %s2298_s1 = sld [smem:[#allocation32_spill]]  ;;  %s1381_s0 = sshll.u32 %s2071_s22, 3 }
  0x79   : > { %v1558_v57 = vld [vmem:[%s2296_s17] ss:$0 sm:$0xff]  ;;  %s2299_s9 = sld [smem:[#allocation28_spill]]  ;;  %s673_s18 = scalar_lea.vmem [#allocation12], %s1381_s0 }
  0x7a   : > { %1390 = vmatmul.msk.bf16.vlgmr.msra.gmra.mxu0 %vm697_vm0, %v675_v4  ;;  %780 = vmatpush.bf16.msra.mxu2 %v1460_v39  ;;  %s2300_s23 = sld [smem:[#allocation29_spill]] }
  0x7b   : > { %1399 = vmatmul.msk.bf16.vlgmr.msra.gmra.mxu1 %vm697_vm0, %v676_v5  ;;  %s2301_s13 = sld [smem:[#allocation31_spill]] }
  0x7c   : > { %s2302_s28 = sld [smem:[#allocation33_spill]] }
  0x7d   : > { %1408 = vmatmul.msk.bf16.vlgmr.msra.gmra.mxu2 %vm697_vm0, %v676_v5 }
  0xf7   : > { %v710_v8 = vpop.f32.mrf.mxu0 }
  0xf8   : > { %v748_v9 = vpop.f32.mrf.mxu1  ;;  %v711_v10 = vadd.f32 %v1556_v6, %v710_v8 }
  0xf9   : > { %v749_v11 = vadd.f32 %v1557_v7, %v748_v9 }
  0xfa   : > { %v714_v12 = vmul.f32 0.35355338, %v711_v10 }
  0xfb   : > { %v752_v13 = vpack.c.bf16 %v749_v11, %v749_v11 }
  0xfc   : > { %v715_v14 = vpack.c.bf16 %v714_v12, %v714_v12 }
  0xfd   : > { %v851_v15 = vunpack.c.l.b16 %v752_v13  ;;  %v795_v16 = vsel %vm790_vm1, %v752_v13, 0 }
  0xfe   : > { %804 = vmatpush.bf16.xpose.msra.mxu3 %v795_v16  ;;  %v846_v17 = vunpack.c.l.b16 %v715_v14 }
  0xff   : > { %v852_v18 = vpack.c.b16 %v851_v15, %v851_v15  ;;  %v712_v19 = vpop.f32.mrf.mxu0 }
 0x100   : > { %v750_v20 = vpop.f32.mrf.mxu1  ;;  %v847_v21 = vpack.c.b16 %v846_v17, %v846_v17  ;;  %v782_v58 = vpop.f32.mrf.mxu2 }
 0x101   : > { %919 = vrot.lane.b32.xlu1 %v852_v18, %s1816_s19  ;;  %853 = vrot.lane.b32.xlu0 %v852_v18, %s1817_s27  ;;  %v783_v59 = vadd.f32 %v1558_v57, %v782_v58 }
 0x102   : > { %917 = vrot.lane.b32.xlu2 %v847_v21, %s1816_s19 }
 0x103   : > { %v786_v60 = vpack.c.bf16 %v783_v59, %v783_v59 }
 0x105   : > { %1409 = vmatmul.msk.bf16.vlgmr.msra.gmra.mxu3 %vm790_vm1, %v715_v14  ;;  %v887_v61 = vunpack.c.l.b16 %v786_v60  ;;  %v827_v62 = vsel %vm825_vm2, %v786_v60, 0 }
 0x106   : > { %836 = vmatpush.bf16.msrb.mxu0 %v827_v62 }
 0x107   : > { %v888_v63 = vpack.c.b16 %v887_v61, %v887_v61  ;;  %v1822_v61 = vmov 32.0  }
 0x108   : > { %v784_v0 = vpop.f32.mrf.mxu2 }
 0x109   : > { %982 = vrot.lane.b32.xlu1 %v852_v18, %s1818_s10  ;;  %848 = vrot.lane.b32.xlu0 %v847_v21, %s1817_s27 }
 0x10a   : > { %980 = vrot.lane.b32.xlu2 %v847_v21, %s1818_s10 }
 0x15c   : > { %v918_v27 = vpop.permute.xlu2 %917 }
 0x164   : > { %v981_v36 = vpop.permute.xlu2 %980 }
 0x173   : > { %v920_v23 = vpop.permute.xlu1 %919  ;;  %v854_v24 = vpop.permute.xlu0 %853 }
 0x174   : > { %v859_v25 = vsel %vm790_vm1, %v854_v24, 0  ;;  %v925_v26 = vsel %vm790_vm1, %v920_v23, 0 }
 0x175   : > { %868 = vmatpush.bf16.xpose.msrb.mxu1 %v859_v25  ;;  %934 = vmatpush.bf16.xpose.msrb.mxu3 %v925_v26 }
 0x17b   : > { %v983_v28 = vpop.permute.xlu1 %982  ;;  %v849_v29 = vpop.permute.xlu0 %848 }
 0x17c   : > { %v988_v30 = vsel %vm790_vm1, %v983_v28, 0  ;;  %1411 = vmatmul.msk.bf16.vlgmr.msrb.gmra.mxu1 %vm790_vm1, %v849_v29  ;;  %1413 = vmatmul.msk.bf16.vlgmr.msrb.gmra.mxu3 %vm790_vm1, %v918_v27 }
 0x17d   : > { %997 = vmatpush.bf16.xpose.msra.mxu1 %v988_v30 }
 0x188   : > { %v806_v34 = vpop.f32.mrf.mxu3 }
 0x189   : > { %v807_v35 = vadd.f32 %v806_v34, %v789_v33 }
 0x18b   : > { %v810_v37 = vsel %vm790_vm1, %v807_v35, -inf }
 0x18c   : > { %1415 = vmatmul.msk.bf16.vlgmr.msra.gmra.mxu1 %vm790_vm1, %v981_v36  ;;  %811 = vmax.xlane.f32.xlu1 %v810_v37 }
 0x190   : > { %v808_v38 = vpop.f32.mrf.mxu3 }
 0x1f9   : > { %v870_v40 = vpop.f32.mrf.mxu1 }
 0x1fa   : > { %v871_v41 = vadd.f32 %v870_v40, %v789_v33 }
 0x1fc   : > { %v874_v42 = vsel %vm790_vm1, %v871_v41, -inf }
 0x1fd   : > { %875 = vmax.xlane.f32.xlu0 %v874_v42 }
 0x1ff   : > { %v936_v43 = vpop.f32.mrf.mxu3  ;;  %v812_v44 = vpop.xlane.xlu1 %811 }
 0x200   : > { %v813_v45 = vsub.f32 %v807_v35, %v812_v44  ;;  %v937_v54 = vadd.f32 %v936_v43, %v789_v33 }
 0x201   : > { %v872_v46 = vpop.f32.mrf.mxu1 }
 0x202   : > { %v814_v47 = vmul.f32 1.442695, %v813_v45  ;;  %v940_v56 = vsel %vm790_vm1, %v937_v54, -inf }
 0x204   : > { %1564 = vpow2.f32 %v814_v47 }
 0x207   : > { %v938_v48 = vpop.f32.mrf.mxu3 }
 0x209   : > { %v999_v49 = vpop.f32.mrf.mxu1 }
 0x20a   : > { %v1565_v50 = vpop.eup %1564  ;;  %v1000_v51 = vadd.f32 %v999_v49, %v789_v33 }
 0x20b   : > { %v816_v52 = vsel %vm790_vm1, %v1565_v50, 0.0 }
 0x20c   : > { %817 = vadd.xlane.f32.xlu1 %v816_v52  ;;  %v1003_v53 = vsel %vm790_vm1, %v1000_v51, -inf  ;;  %v1462_v52 = vld [vmem:[#allocation9] sm:$0xff] }
 0x20d   : > { %1004 = vmax.xlane.f32.xlu2 %v1003_v53 }
 0x211   : > { %v1001_v55 = vpop.f32.mrf.mxu1 }
 0x215   : > { %941 = vmax.xlane.f32.xlu2 %v940_v56  ;;  %v1559_v56 = vld [vmem:[%s2297_s12] ss:$0 sm:$0xff]  ;;  %s1453_s12 = sshll.u32 %s1937_s30, 3  ;;  %s1217_s30 = scalar_lea.sflag [#allocation5], %s2071_s22 }
 0x22d   : > { %889 = vrot.lane.b32.xlu2 %v888_v63, %s1817_s27 }
 0x270   : > { %v876_v1 = vpop.xlane.xlu0 %875 }
 0x271   : > { %v877_v2 = vsub.f32 %v871_v41, %v876_v1 }
 0x273   : > { %v878_v3 = vmul.f32 1.442695, %v877_v2 }
 0x275   : > { %1566 = vpow2.f32 %v878_v3 }
 0x27b   : > { %v1567_v4 = vpop.eup %1566 }
 0x27c   : > { %v880_v5 = vsel %vm790_vm1, %v1567_v4, 0.0 }
 0x27d   : > { %881 = vadd.xlane.f32.xlu0 %v880_v5 }
 0x27f   : > { %v818_v6 = vpop.xlane.xlu1 %817 }
 0x280   : > { %1568 = vrcp.f32 %v818_v6  ;;  %v1005_v7 = vpop.xlane.xlu2 %1004 }
 0x281   : > { %v1006_v8 = vsub.f32 %v1000_v51, %v1005_v7  ;;  %v1463_v51 = vld [vmem:[#allocation9 + $0x8] sm:$0xff] }
 0x282   : > { %1073 = vmatpush.bf16.msra.mxu3 %v1463_v51 }
 0x283   : > { %v1007_v9 = vmul.f32 1.442695, %v1006_v8 }
 0x285   : > { %1570 = vpow2.f32 %v1007_v9  ;;  %v1465_v9 = vld [vmem:[#allocation11 + $0x8] sm:$0xff] }
 0x286   : > { %v1569_v10 = vpop.eup %1568  ;;  %1074 = vmatpush.bf16.msra.mxu3 %v1462_v52 }
 0x287   : > { %v820_v11 = vmul.f32 %v1569_v10, %v1565_v50  ;;  %v1464_v10 = vld [vmem:[#allocation11] sm:$0xff] }
 0x288   : > { %v942_v12 = vpop.xlane.xlu2 %941 }
 0x289   : > { %v943_v13 = vsub.f32 %v937_v54, %v942_v12  ;;  %v821_v14 = vpack.c.bf16 %v820_v11, %v820_v11 }
 0x28b   : > { %v1571_v15 = vpop.eup %1570  ;;  %v944_v16 = vmul.f32 1.442695, %v943_v13  ;;  %1410 = vmatmul.msk.bf16.vlgmr.msrb.gmra.mxu0 %vm790_vm1, %v821_v14  ;;  %v1469_v13 = vld [vmem:[%s2298_s1 + $0x18] sm:$0xff] }
 0x28c   : > { %v1009_v17 = vsel %vm790_vm1, %v1571_v15, 0.0  ;;  %1205 = vmatpush.bf16.msrb.mxu1 %v1469_v13 }
 0x28d   : > { %1572 = vpow2.f32 %v944_v16  ;;  %1010 = vadd.xlane.f32.xlu0 %v1009_v17 }
 0x290   : > { %v890_v20 = vpop.permute.xlu2 %889 }
 0x291   : > { %v895_v21 = vsel %vm825_vm2, %v890_v20, 0 }
 0x292   : > { %904 = vmatpush.bf16.msrb.mxu2 %v895_v21 }
 0x293   : > { %v1573_v18 = vpop.eup %1572 }
 0x294   : > { %v946_v19 = vsel %vm790_vm1, %v1573_v18, 0.0 }
 0x295   : > { %947 = vadd.xlane.f32.xlu1 %v946_v19 }
 0x2a1   : > { %1015 = vrot.lane.b32.xlu0 %v888_v63, %s1818_s10  ;;  %s2303_s10 = sld [smem:[#allocation34_spill]] }
 0x2a7   : > { %s1227_s15 = scalar_lea.hbm %s2303_s10, %s1453_s12 }
 0x2a8   : > { %s1231_s29 = sshll.u32 %s1227_s15, 4  ;;  %s1232_s29 = int_to_ptr.hbm [resolvable:$true] %s1231_s29 }
 0x2a9   : > { %s1750_s8 = sshra.s32 %s1232_s29, 4  ;;  %s1751_s8 = int_to_ptr.hbm [resolvable:$true] %s1750_s8 }
 0x2aa   : > { %s1752_s17 = scalar_lea.hbm %s1751_s8, 8  ;;  %p1757_p4 = scmp.lt.s32.totalorder %s1751_s8, %s2303_s10 }
 0x2ab   : > { %p1753_p13 = scmp.ne.s32.totalorder %s1751_s8, %s1752_s17 }
 0x2ad   : > { %p1754_p9 = pnand %p1753_p13, %p1982_p0 }
 0x2ae   : > { %952 = vrot.lane.b32.xlu1 %v888_v63, %s1816_s19 }
 0x2af   : > { %p1755_p2 = pneg %p1754_p9 }
 0x2f0   : > { %v882_v22 = vpop.xlane.xlu0 %881 }
 0x2f1   : > { %1574 = vrcp.f32 %v882_v22 }
 0x2f7   : > { %v1575_v23 = vpop.eup %1574 }
 0x2f8   : > { %v884_v24 = vmul.f32 %v1575_v23, %v1567_v4 }
 0x2fa   : > { %v885_v25 = vpack.c.bf16 %v884_v24, %v884_v24 }
 0x2fc   : > { %1412 = vmatmul.msk.bf16.vlgmr.msrb.gmra.mxu2 %vm790_vm1, %v885_v25 }
 0x300   : > { %v1011_v26 = vpop.xlane.xlu0 %1010 }
 0x301   : > { %1576 = vrcp.f32 %v1011_v26  ;;  %v1560_v26 = vld [vmem:[%s2299_s9] ss:$0 sm:$0xff] }
 0x307   : > { %v1577_v29 = vpop.eup %1576 }
 0x308   : > { %v838_v27 = vpop.f32.mrf.mxu0  ;;  %v1013_v31 = vmul.f32 %v1577_v29, %v1571_v15  ;;  %v948_v32 = vpop.xlane.xlu1 %947  ;;  %v1468_v15 = vld [vmem:[%s2298_s1 + $0x10] sm:$0xff] }
 0x309   : > { %v842_v28 = vpack.c.bf16 %v838_v27, %v838_v27  ;;  %1578 = vrcp.f32 %v948_v32  ;;  %1206 = vmatpush.bf16.msrb.mxu1 %v1468_v15 }
 0x30a   : > { %v1014_v35 = vpack.c.bf16 %v1013_v31, %v1013_v31  ;;  %1580 = vrcp.f32 %v1822_v61 }
 0x30b   : > { %844 = vst.msk [vmem:[#allocation2] sm:$0xf] %vm843_vm3, %v842_v28  ;;  %v1561_v28 = vld [vmem:[%s2300_s23] ss:$0 sm:$0xff]  ;;  %s1229_s23 = sshll.u32 %s673_s18, 4  ;;  %s1230_s23 = int_to_ptr.vmem [resolvable:$true] %s1229_s23 }
 0x30f   : > { %v1579_v36 = vpop.eup %1578 }
 0x310   : > { %v840_v30 = vpop.f32.mrf.mxu0  ;;  %v950_v37 = vmul.f32 %v1579_v36, %v1573_v18  ;;  %v1581_v62 = vpop.eup %1580 }
 0x311   : > { %v1084_v63 = vmul.f32 32.0, %v1581_v62  ;;  %vm1088_vm7 = vweird.f32 %v1581_v62 }
 0x312   : > { %v951_v40 = vpack.c.bf16 %v950_v37, %v950_v37 }
 0x313   : > { %v1016_v33 = vpop.permute.xlu0 %1015  ;;  %v1085_v0 = vsub.f32 1.0, %v1084_v63 }
 0x314   : > { %v1021_v34 = vsel %vm825_vm2, %v1016_v33, 0  ;;  %v1467_v33 = vld [vmem:[%s2298_s1 + $0x8] sm:$0xff] }
 0x315   : > { %1030 = vmatpush.bf16.msra.mxu2 %v1021_v34  ;;  %v1086_v1 = vmul.f32 %v1581_v62, %v1085_v0  ;;  %1207 = vmatpush.bf16.msrb.mxu1 %v1467_v33  ;;  %v1466_v34 = vld [vmem:[%s2298_s1] sm:$0xff] }
 0x317   : > { %v1087_v2 = vadd.f32 %v1581_v62, %v1086_v1 }
 0x318   : > { %1416 = vmatmul.msk.bf16.vlgmr.msra.gmra.mxu2 %vm790_vm1, %v1014_v35  ;;  %v1562_v35 = vld [vmem:[%s2301_s13] ss:$0 sm:$0xff] }
 0x319   : > { %v1089_v3 = vsel %vm1088_vm7, %v1581_v62, %v1087_v2  ;;  %1208 = vmatpush.bf16.msrb.mxu1 %v1466_v34 }
 0x320   : > { %v953_v38 = vpop.permute.xlu1 %952 }
 0x321   : > { %v958_v39 = vsel %vm825_vm2, %v953_v38, 0 }
 0x322   : > { %967 = vmatpush.bf16.msra.mxu0 %v958_v39 }
 0x325   : > { %1414 = vmatmul.msk.bf16.vlgmr.msra.gmra.mxu0 %vm790_vm1, %v951_v40 }
 0x326   : > { %1152 = vmatpush.bf16.msrb.mxu0 %v1465_v9 }
 0x32a   : > { %1153 = vmatpush.bf16.msrb.mxu0 %v1464_v10 }
 0x37f   : > { %v906_v41 = vpop.f32.mrf.mxu2 }
 0x380   : > { %v910_v42 = vpack.c.bf16 %v906_v41, %v906_v41  ;;  %v1563_v41 = vld [vmem:[%s2302_s28] ss:$0 sm:$0xff] }
 0x382   : > { %912 = vrot.lane.b32.xlu2 %v910_v42, %s1819_s24 }
 0x387   : > { %v908_v43 = vpop.f32.mrf.mxu2 }
 0x39b   : > { %v1032_v44 = vpop.f32.mrf.mxu2 }
 0x39c   : > { %v1036_v45 = vpack.c.bf16 %v1032_v44, %v1032_v44 }
 0x39e   : > { %1038 = vrot.lane.b32.xlu2 %v1036_v45, %s1820_s14 }
 0x3a2   : > { %v969_v46 = vpop.f32.mrf.mxu0 }
 0x3a3   : > { %v973_v47 = vpack.c.bf16 %v969_v46, %v969_v46  ;;  %v1034_v48 = vpop.f32.mrf.mxu2 }
 0x3a5   : > { %975 = vrot.lane.b32.xlu0 %v973_v47, %s1821_s11  ;;  %s1756_s11 = scalar_lea.hbm %s2303_s10, 16 }
 0x3a6   : > { %p1758_p1 = scmp.lt.s32.totalorder %s1756_s11, %s1752_s17 }
 0x3a8   : > { %p1759_p7 = por %p1758_p1, %p1757_p4 }
 0x3aa   : > { %v971_v49 = vpop.f32.mrf.mxu0  ;;  %p1760_p10 = pnand %p1759_p7, %p1755_p2 }
 0x3dc   : > { %v913_v50 = vpop.permute.xlu2 %912 }
 0x3dd   : > { %916 = vst.msk [vmem:[#allocation2] sm:$0xf] %vm915_vm4, %v913_v50 }
 0x3f8   : > { %v1039_v54 = vpop.permute.xlu2 %1038 }
 0x417   : > { %v976_v53 = vpop.permute.xlu0 %975 }
 0x418   : > { %979 = vst.msk [vmem:[#allocation2] sm:$0xf] %vm978_vm5, %v976_v53 }
 0x419   : > { %1042 = vst.msk [vmem:[#allocation2] sm:$0xf] %vm1041_vm6, %v1039_v54 }
 0x420   : > { %v1043_v55 = vld [vmem:[#allocation2] sm:$0xf] }
 0x421   : > { %1425 = vmatmul.msk.bf16.vlgmr.msra.gmra.mxu3 %vm697_vm0, %v1043_v55 }
 0x4a4   : > { %v1076_v57 = vpop.f32.mrf.mxu3 }
 0x4a5   : > { %v2162_v58 = vadd.f32 %v1559_v56, %v1076_v57 }
 0x4a7   : > { %v1080_v59 = vsel %vm697_vm0, %v2162_v58, 0.0 }
 0x4a8   : > { %1081 = vadd.xlane.f32.xlu1 %v1080_v59 }
 0x4ac   : > { %v1078_v60 = vpop.f32.mrf.mxu3 }
 0x51b   : > { %v1082_v4 = vpop.xlane.xlu1 %1081 }
 0x51c   : > { %v1090_v5 = vmul.f32 %v1089_v3, %v1082_v4 }
 0x51e   : > { %v1091_v6 = vsub.f32 %v2162_v58, %v1090_v5 }
 0x520   : > { %v1092_v7 = vmul.f32 %v1091_v6, %v1091_v6  ;;  %v1115_v27 = vmul.f32 %v1560_v26, %v1091_v6 }
 0x522   : > { %v1093_v8 = vsel %vm697_vm0, %v1092_v7, 0.0 }
 0x523   : > { %1094 = vadd.xlane.f32.xlu0 %v1093_v8 }
 0x596   : > { %v1095_v11 = vpop.xlane.xlu0 %1094 }
 0x597   : > { %v1096_v12 = vmul.f32 0.032258064, %v1095_v11 }
 0x599   : > { %1582 = vrsqrt.f32 %v1096_v12  ;;  %vm1104_vm8 = vcmp.eq.f32.partialorder %v1096_v12, inf  ;;  %v1107_v22 = vand.u32 2147483648, %v1096_v12  ;;  %vm1106_vm9 = vcmp.eq.f32.partialorder %v1096_v12, 0.0 }
 0x59f   : > { %v1583_v14 = vpop.eup %1582 }
 0x5a0   : > { %v1098_v16 = vmul.f32 %v1583_v14, %v1096_v12 }
 0x5a2   : > { %v1099_v17 = vmul.f32 %v1583_v14, %v1098_v16 }
 0x5a4   : > { %v1100_v18 = vmul.f32 0.5, %v1099_v17 }
 0x5a6   : > { %v1101_v19 = vsub.f32 1.5, %v1100_v18 }
 0x5a8   : > { %v1102_v20 = vmul.f32 %v1583_v14, %v1101_v19 }
 0x5aa   : > { %v1103_v21 = vmul.f32 %v1102_v20, %v1096_v12 }
 0x5ac   : > { %v1105_v23 = vsel %vm1104_vm8, %v1096_v12, %v1103_v21 }
 0x5ad   : > { %v1108_v24 = vsel %vm1106_vm9, %v1107_v22, %v1105_v23 }
 0x5ae   : > { %v1109_v25 = vadd.f32 1e-06, %v1108_v24 }
 0x5b0   : > { %1584 = vrcp.f32 %v1109_v25 }
 0x5b6   : > { %v1585_v29 = vpop.eup %1584 }
 0x5b7   : > { %v1116_v30 = vmul.f32 %v1585_v29, %v1115_v27 }
 0x5b9   : > { %v1121_v31 = vadd.f32 %v1561_v28, %v1116_v30 }
 0x5bb   : > { %v1122_v32 = vpack.c.bf16 %v1121_v31, %v1121_v31 }
 0x5bd   : > { %1434 = vmatmul.msk.bf16.vlgmr.msrb.gmra.mxu0 %vm697_vm0, %v1122_v32 }
 0x63a   : > { %v1155_v36 = vpop.f32.mrf.mxu0 }
 0x63b   : > { %v1156_v37 = vadd.f32 %v1562_v35, %v1155_v36 }
 0x63d   : > { %v1159_v38 = vmax.f32 %v1156_v37, 0.0 }
 0x63f   : > { %v1160_v39 = vpack.c.bf16 %v1159_v38, %v1159_v38 }
 0x641   : > { %1451 = vmatmul.msk.bf16.vlgmr.msrb.gmra.mxu1 %vm1197_vm10, %v1160_v39 }
 0x642   : > { %v1157_v40 = vpop.f32.mrf.mxu0 }
 0x6be   : > { %v1210_v42 = vpop.f32.mrf.mxu1 }
 0x6bf   : > { %v1211_v43 = vadd.f32 %v1563_v41, %v1210_v42 }
 0x6c1   : > { %v1214_v44 = vadd.f32 %v1211_v43, %v2162_v58 }
 0x6c3   : > { %1215 = vst.msk [vmem:[%s673_s18] sm:$0xff] %vm697_vm0, %v1214_v44 }
 0x6c4   : > { %1763 = shalt.err (!%p1760_p10)
}
 0x6c5   : > { %1484 = dma.vmem_to_hbm [thread:$0]  (%p1982_p0), %s1230_s23, 128, %s1232_s29, %s1217_s30  }
 0x6c6   : > { %v1212_v45 = vpop.f32.mrf.mxu1 }
 0x6c7 PF: > { %s2305_s22 = sld [smem:[#allocation17_spill]] }
 0x6c8   : > { %s2307_s20 = sld [smem:[#allocation18_spill]] }
 0x6cd   : > { %s1243_s21 = sand.u32 1, %s2305_s22  }
 0x6ce   : > { %p2308_p6 = scmp.ge.s32.totalorder %s2307_s20, 2  ;;  %s1244_s28 = scalar_lea.sflag [#allocation5], %s1243_s21 }
 0x6d0   : > { %p1504_p11 = pnand %p2308_p6, %p1988_p5 }
 0x6d2   : > { %p1505_p12 = pneg %p1504_p11 }
 0x6d4   : > { %1793 = dma.done.wait (%p1505_p12), %s1244_s28, 128  }
 0x6d5   : > { %1795 = vsyncadd (%p1505_p12), %s1244_s28, 4294967168  ;;  %s2309_s27 = sld [smem:[#allocation19_spill]]  ;;  %s2311_s24 = smov %s1802_s25 }
 0x6d6   : > { %s2310_s19 = sld [smem:[#allocation20_spill]]  ;;  %s2312_s25 = smov %s1806_s26 }
 0x6db   : > { %p34_p3 = scmp.ge.s32.totalorder %s2309_s27, 4  }
 0x6dc   : > { %s2313_s26 = smov %s2310_s19 }
 0x6dd   :  { %36 = sbr.rel (!%p34_p3) target bundleno = 21 (0x15), region = 165 }
 0x6e2   :  { %1250 = vsyncpa [#allocation4], 1 }
 0x6e3   :  { %1252 = vsyncpa [#allocation4 + $0x1], 1 }
 0x6e4   :  { %1253 = vsyncpa [#allocation7], 1 }
 0x6e5   :  { %1255 = vsyncpa [#allocation7 + $0x1], 1 }
 0x6e6   :  { %1256 = vsyncpa [#allocation10], 1 }
 0x6e7   :  { %1257 = vsyncpa [#allocation5], 1 }
 0x6e8   :  { %1259 = vsyncpa [#allocation5 + $0x1], 1 }

</bundles_post_ra>
